<compile_context>
chip_gen: v7x
topology: tpu7x:2x2x1
jax: 0.10.0
libtpu: 0.0.40
codegen_flags: <defaults>
</compile_context>

<pallas_src>
import math
import functools

import jax
import jax.numpy as jnp
from jax.experimental import pallas as pl
from jax.experimental.pallas import tpu as pltpu


def _round_up(x, m):
    return ((x + m - 1) // m) * m


def make_lstm_kernel(num_layers, T, H, Gp, Tc):
    """Kernel over one batch block: full stacked-LSTM recurrence + final FC in VMEM."""

    def kernel(*refs):
        # refs = [x, (w_ih_t, w_hh_t, b) * num_layers, w_fc, b_fc, out, gx_scr, hseq_scr]
        x_ref = refs[0]
        idx = 1
        layer_params = []
        for _ in range(num_layers):
            layer_params.append((refs[idx], refs[idx + 1], refs[idx + 2]))
            idx += 3
        w_fc_ref, b_fc_ref, out_ref = refs[idx], refs[idx + 1], refs[idx + 2]
        gx_ref, hseq_ref = refs[idx + 3], refs[idx + 4]

        Bt = out_ref.shape[0]
        I = x_ref.shape[-1]

        # Hoisted lane mask (JAX does not CSE broadcast_in_dim inside loops):
        # tanh on the g-gate lanes [2H, 3H), sigmoid elsewhere.
        lane = jax.lax.broadcasted_iota(jnp.int32, (1, Gp), 1)
        g_mask = (lane >= 2 * H) & (lane < 3 * H)

        h_last = None
        for layer, (w_ih_ref, w_hh_ref, b_ref) in enumerate(layer_params):
            w_ih_t = w_ih_ref[...]          # (in_dim, Gp) bf16
            w_hh_t = w_hh_ref[...]          # (H, Gp)      bf16
            b = b_ref[...]                  # (1, Gp)      f32
            last = layer == num_layers - 1

            # --- Input projection for all timesteps, chunked over time -------------
            # One bf16 MXU matmul (f32 accumulation) per chunk, written directly into
            # the time-major gx scratch so the live value stays bounded by the chunk.
            for t0 in range(0, T, Tc):
                tc = min(Tc, T - t0)
                if layer == 0:
                    chunk = x_ref[pl.ds(t0, tc)].reshape(tc * Bt, I)        # bf16
                else:
                    chunk = hseq_ref[pl.ds(t0, tc)].reshape(tc * Bt, H)     # bf16
                gx = jnp.dot(chunk, w_ih_t, preferred_element_type=jnp.float32) + b
                gx_ref[pl.ds(t0, tc)] = gx.reshape(tc, Bt, Gp)
            # TODO(synk): double-buffer gx chunks and interleave the projection with
            # the recurrence to overlap MXU projection with the latency-bound loop.

            # --- Time recurrence (serial dependence chain) --------------------------
            def step(t, carry):
                h_t, c_t = carry                                   # (Bt, H) f32
                gates = gx_ref[t] + jnp.dot(
                    h_t.astype(jnp.bfloat16), w_hh_t,
                    preferred_element_type=jnp.float32)            # (Bt, Gp) f32
                # One masked activation pass over the packed [i|f|g|o] gates.
                act = jnp.where(g_mask, jnp.tanh(gates), jax.nn.sigmoid(gates))
                i_a = act[:, 0 * H:1 * H]
                f_a = act[:, 1 * H:2 * H]
                g_a = act[:, 2 * H:3 * H]
                o_a = act[:, 3 * H:4 * H]
                c_n = f_a * c_t + i_a * g_a
                h_n = o_a * jnp.tanh(c_n)
                if not last:
                    # Hidden sequence feeds the next layer's projection (bf16 MXU).
                    hseq_ref[t] = h_n.astype(jnp.bfloat16)
                return (h_n, c_n)

            zeros = jnp.zeros((Bt, H), jnp.float32)
            h_last, _ = jax.lax.fori_loop(
                0, T, step, (zeros, zeros),
                unroll=True if T <= 32 else 8)

        # Final FC (H -> 1): VPU multiply + lane reduction (avoid an N=1 MXU matmul).
        out_ref[...] = (jnp.sum(h_last * w_fc_ref[...], axis=-1, keepdims=True)
                        + b_fc_ref[...])

    return kernel


def _pack_gate_matrix(w, in_pad, H, Gp):
    """torch (4H, in_dim) weight -> (in_pad, Gp) bf16; gates packed at cols [0, 4H)."""
    in_dim = w.shape[1]
    out = jnp.zeros((in_pad, Gp), jnp.bfloat16)
    return out.at[:in_dim, :4 * H].set(w.T.astype(jnp.bfloat16))


def _pack_gate_bias(b, H, Gp):
    out = jnp.zeros((1, Gp), jnp.float32)
    return out.at[0, :4 * H].set(b)


def _pick_batch_tile(B):
    """MXU-row-sized batch tile, keeping >=2 grid blocks when the batch allows."""
    B8 = _round_up(B, 8)
    Bt = min(B8, 256)
    if B8 > 8 and B8 // Bt < 2:
        Bt = _round_up(max(8, B8 // 2), 8)
    return Bt


def lstm_forward(x, params, num_layers, hidden_size):
    B, T, I = x.shape
    H = hidden_size
    Gp = _round_up(4 * H, 128)        # compact, lane-padded gate container [i|f|g|o]
    Tc = min(T, 32)                   # time-chunk for the input projection

    Bt = _pick_batch_tile(B)
    B_pad = _round_up(B, Bt)

    # Wrapper-side layout plumbing: pad batch, go time-major, bf16 activations input,
    # pack/transpose weights (gate order i,f,g,o; b = b_ih + b_hh).
    x_pad = jnp.zeros((B_pad, T, I), jnp.bfloat16).at[:B].set(x.astype(jnp.bfloat16))
    x_t = jnp.transpose(x_pad, (1, 0, 2))        # (T, B_pad, I)

    inputs = [x_t]
    in_specs = [pl.BlockSpec((T, Bt, I), lambda b: (0, b, 0))]
    for l in range(num_layers):
        w_ih, w_hh, b_ih, b_hh = params[f"layer{l}"]
        in_pad = I if l == 0 else H
        w_ih_t = _pack_gate_matrix(w_ih, in_pad, H, Gp)   # (in_dim, Gp) bf16
        w_hh_t = _pack_gate_matrix(w_hh, H, H, Gp)        # (H, Gp)      bf16
        b = _pack_gate_bias(b_ih + b_hh, H, Gp)           # (1, Gp)      f32
        inputs.extend([w_ih_t, w_hh_t, b])
        in_specs.extend([
            pl.BlockSpec(w_ih_t.shape, lambda b: (0, 0)),
            pl.BlockSpec(w_hh_t.shape, lambda b: (0, 0)),
            pl.BlockSpec(b.shape, lambda b: (0, 0)),
        ])
        # TODO(synk): mark these grid-invariant weights single-buffered
        # (pipeline_mode=pl.Buffered(1)) once verified on the target toolchain.

    w_fc = params["fc_w"].astype(jnp.float32)             # (1, H)
    b_fc = params["fc_b"].reshape(1, 1).astype(jnp.float32)
    inputs.extend([w_fc, b_fc])
    in_specs.extend([pl.BlockSpec((1, H), lambda b: (0, 0)),
                     pl.BlockSpec((1, 1), lambda b: (0, 0))])

    kernel = make_lstm_kernel(num_layers, T, H, Gp, Tc)

    # VMEM budget: scratches + double-buffered x block + (conservatively) 2x weights.
    bytes_gx = T * Bt * Gp * 4
    bytes_hseq = T * Bt * H * 2
    bytes_x = 2 * T * Bt * I * 2
    bytes_w = 2 * sum(int(a.size) * a.dtype.itemsize for a in inputs[1:])
    vmem_limit = int(min(100 << 20,
                         max(32 << 20,
                             (bytes_gx + bytes_hseq + bytes_x + bytes_w) * 3 // 2
                             + (4 << 20))))

    out_pad = pl.pallas_call(
        kernel,
        out_shape=jax.ShapeDtypeStruct((B_pad, 1), jnp.float32),
        grid=(B_pad // Bt,),
        in_specs=in_specs,
        out_specs=pl.BlockSpec((Bt, 1), lambda b: (b, 0)),
        scratch_shapes=[pltpu.VMEM((T, Bt, Gp), jnp.float32),    # gate pre-activations
                        pltpu.VMEM((T, Bt, H), jnp.bfloat16)],   # hidden sequence
        compiler_params=pltpu.CompilerParams(
            dimension_semantics=("parallel",),
            vmem_limit_bytes=vmem_limit),
    )(*inputs)
    return out_pad[:B]


def init_params(key, input_size, hidden_size, num_layers):
    """Deterministic init mirroring torch's uniform(-1/sqrt(H), 1/sqrt(H))."""
    k = 1.0 / math.sqrt(hidden_size)
    params = {}
    for l in range(num_layers):
        in_dim = input_size if l == 0 else hidden_size
        key, k1, k2, k3, k4 = jax.random.split(key, 5)
        params[f"layer{l}"] = (
            jax.random.uniform(k1, (4 * hidden_size, in_dim), jnp.float32, -k, k),
            jax.random.uniform(k2, (4 * hidden_size, hidden_size), jnp.float32, -k, k),
            jax.random.uniform(k3, (4 * hidden_size,), jnp.float32, -k, k),
            jax.random.uniform(k4, (4 * hidden_size,), jnp.float32, -k, k),
        )
    key, k1, k2 = jax.random.split(key, 3)
    params["fc_w"] = jax.random.uniform(k1, (1, hidden_size), jnp.float32, -k, k)
    params["fc_b"] = jax.random.uniform(k2, (1,), jnp.float32, -k, k)
    return params


def lstm_reference(x, params, num_layers, hidden_size):
    """Pure-JAX f32 reference matching torch nn.LSTM + nn.Linear semantics."""
    B, T, _ = x.shape
    seq = x
    H = hidden_size
    for l in range(num_layers):
        w_ih, w_hh, b_ih, b_hh = params[f"layer{l}"]
        h = jnp.zeros((B, H), jnp.float32)
        c = jnp.zeros((B, H), jnp.float32)
        hs = []
        for t in range(T):
            gates = seq[:, t, :] @ w_ih.T + b_ih + h @ w_hh.T + b_hh
            i_g = jax.nn.sigmoid(gates[:, 0 * H:1 * H])
            f_g = jax.nn.sigmoid(gates[:, 1 * H:2 * H])
            g_g = jnp.tanh(gates[:, 2 * H:3 * H])
            o_g = jax.nn.sigmoid(gates[:, 3 * H:4 * H])
            c = f_g * c + i_g * g_g
            h = o_g * jnp.tanh(c)
            hs.append(h)
        seq = jnp.stack(hs, axis=1)
    return seq[:, -1, :] @ params["fc_w"].T + params["fc_b"]


if __name__ == "__main__":
    input_size = 4
    hidden_size = 32
    num_layers = 2
    batch = 2
    seq_len = 8

    key = jax.random.PRNGKey(0)
    key, xkey = jax.random.split(key)
    x = jax.random.normal(xkey, (batch, seq_len, input_size), jnp.float32)
    params = init_params(key, input_size, hidden_size, num_layers)

    fwd = jax.jit(functools.partial(lstm_forward, num_layers=num_layers,
                                    hidden_size=hidden_size))
    out = fwd(x, params)
    jax.block_until_ready(out)

    ref = lstm_reference(x, params, num_layers, hidden_size)
    assert out.shape == (batch, 1)
    # bf16 MXU inputs / bf16 layer-to-layer activations (f32 accumulation & gate math)
    # -> bf16-class tolerance vs the f32 reference.
    assert jnp.allclose(out, ref, atol=2e-2, rtol=2e-2), \
        f"max abs err {jnp.max(jnp.abs(out - ref))}"

    print("KERNEL_OK")
</pallas_src>

<mosaic_0001>
module attributes {stable_mosaic.version = 11 : i64} {
  func.func @kernel(%arg0: i32, %arg1: memref<8x8x4xbf16, #tpu.memory_space<vmem>>, %arg2: memref<4x128xbf16, #tpu.memory_space<vmem>>, %arg3: memref<32x128xbf16, #tpu.memory_space<vmem>>, %arg4: memref<1x128xf32, #tpu.memory_space<vmem>>, %arg5: memref<32x128xbf16, #tpu.memory_space<vmem>>, %arg6: memref<32x128xbf16, #tpu.memory_space<vmem>>, %arg7: memref<1x128xf32, #tpu.memory_space<vmem>>, %arg8: memref<1x32xf32, #tpu.memory_space<vmem>>, %arg9: memref<1x1xf32, #tpu.memory_space<vmem>>, %arg10: memref<8x1xf32, #tpu.memory_space<vmem>>, %arg11: memref<8x8x128xf32, #tpu.memory_space<vmem>>, %arg12: memref<8x8x32xbf16, #tpu.memory_space<vmem>>) attributes {dimension_semantics = [#tpu.dimension_semantics<parallel>], iteration_bounds = array<i64: 1>, scalar_prefetch = 0 : i64, scratch_operands = 2 : i64, tpu.core_type = #tpu.core_type<tc>, window_params = [{transform_indices = @transform_0, window_bounds = array<i64: 8, 8, 4>}, {pipeline_mode = #tpu.pipeline_mode<synchronous>, transform_indices = @transform_1, window_bounds = array<i64: 4, 128>}, {pipeline_mode = #tpu.pipeline_mode<synchronous>, transform_indices = @transform_2, window_bounds = array<i64: 32, 128>}, {pipeline_mode = #tpu.pipeline_mode<synchronous>, transform_indices = @transform_3, window_bounds = array<i64: 1, 128>}, {pipeline_mode = #tpu.pipeline_mode<synchronous>, transform_indices = @transform_4, window_bounds = array<i64: 32, 128>}, {pipeline_mode = #tpu.pipeline_mode<synchronous>, transform_indices = @transform_5, window_bounds = array<i64: 32, 128>}, {pipeline_mode = #tpu.pipeline_mode<synchronous>, transform_indices = @transform_6, window_bounds = array<i64: 1, 128>}, {pipeline_mode = #tpu.pipeline_mode<synchronous>, transform_indices = @transform_7, window_bounds = array<i64: 1, 32>}, {pipeline_mode = #tpu.pipeline_mode<synchronous>, transform_indices = @transform_8, window_bounds = array<i64: 1, 1>}, {transform_indices = @transform_9, window_bounds = array<i64: 8, 1>}]} {
    %0 = tpu.iota {dimensions = array<i32: 1>} : vector<1x128xi32>
    %c64_i32 = arith.constant 64 : i32
    %1 = vector.broadcast %c64_i32 : i32 to vector<1x128xi32>
    %2 = arith.cmpi sge, %0, %1 : vector<1x128xi32>
    %c96_i32 = arith.constant 96 : i32
    %3 = vector.broadcast %c96_i32 : i32 to vector<1x128xi32>
    %4 = arith.cmpi slt, %0, %3 : vector<1x128xi32>
    %5 = arith.andi %2, %4 : vector<1x128xi1>
    %c0 = arith.constant 0 : index
    %c0_0 = arith.constant 0 : index
    %6 = vector.load %arg2[%c0, %c0_0] : memref<4x128xbf16, #tpu.memory_space<vmem>>, vector<4x128xbf16>
    %c0_1 = arith.constant 0 : index
    %c0_2 = arith.constant 0 : index
    %7 = vector.load %arg3[%c0_1, %c0_2] : memref<32x128xbf16, #tpu.memory_space<vmem>>, vector<32x128xbf16>
    %c0_3 = arith.constant 0 : index
    %c0_4 = arith.constant 0 : index
    %8 = vector.load %arg4[%c0_3, %c0_4] : memref<1x128xf32, #tpu.memory_space<vmem>>, vector<1x128xf32>
    %c0_5 = arith.constant 0 : index
    %c0_6 = arith.constant 0 : index
    %c0_7 = arith.constant 0 : index
    %9 = vector.load %arg1[%c0_5, %c0_6, %c0_7] : memref<8x8x4xbf16, #tpu.memory_space<vmem>>, vector<8x8x4xbf16>
    %10 = vector.shape_cast %9 : vector<8x8x4xbf16> to vector<64x4xbf16>
    %cst = arith.constant dense<0.000000e+00> : vector<64x128xf32>
    %11 = tpu.matmul %10, %6, %cst {dimension_numbers = #tpu.dot_dimension_numbers<[1], [0], [0], [1], [0, 0, 1, 1], [], []>} : vector<64x4xbf16>, vector<4x128xbf16>, vector<64x128xf32> -> vector<64x128xf32>
    %12 = vector.broadcast %8 : vector<1x128xf32> to vector<64x128xf32>
    %13 = arith.addf %11, %12 : vector<64x128xf32>
    %14 = vector.shape_cast %13 : vector<64x128xf32> to vector<8x8x128xf32>
    %c0_8 = arith.constant 0 : index
    %c0_9 = arith.constant 0 : index
    %c0_10 = arith.constant 0 : index
    %15 = vector.load %arg11[%c0_8, %c0_9, %c0_10] : memref<8x8x128xf32, #tpu.memory_space<vmem>>, vector<8x8x128xf32>
    tpu.vector_store %arg11[%c0_8, %c0_9, %c0_10], %14 {strides = array<i32>} : memref<8x8x128xf32, #tpu.memory_space<vmem>>, vector<8x8x128xf32>,
    %cst_11 = arith.constant 0.000000e+00 : f32
    %16 = vector.broadcast %cst_11 : f32 to vector<8x32xf32>
    %c0_i32 = arith.constant 0 : i32
    %17 = arith.index_cast %c0_i32 : i32 to index
    %c0_12 = arith.constant 0 : index
    %c0_13 = arith.constant 0 : index
    %18 = vector.load %arg11[%17, %c0_12, %c0_13] : memref<8x8x128xf32, #tpu.memory_space<vmem>>, vector<1x8x128xf32>
    %19 = vector.shape_cast %18 : vector<1x8x128xf32> to vector<8x128xf32>
    %20 = arith.truncf %16 : vector<8x32xf32> to vector<8x32xbf16>
    %cst_14 = arith.constant dense<0.000000e+00> : vector<8x128xf32>
    %21 = tpu.matmul %20, %7, %cst_14 {dimension_numbers = #tpu.dot_dimension_numbers<[1], [0], [0], [1], [0, 0, 1, 1], [], []>} : vector<8x32xbf16>, vector<32x128xbf16>, vector<8x128xf32> -> vector<8x128xf32>
    %22 = arith.addf %19, %21 : vector<8x128xf32>
    %23 = math.tanh %22 : vector<8x128xf32>
    %24 = arith.negf %22 : vector<8x128xf32>
    %25 = math.exp %24 : vector<8x128xf32>
    %cst_15 = arith.constant 1.000000e+00 : f32
    %26 = vector.broadcast %cst_15 : f32 to vector<8x128xf32>
    %27 = arith.addf %26, %25 : vector<8x128xf32>
    %28 = arith.divf %26, %27 : vector<8x128xf32>
    %29 = vector.shape_cast %5 : vector<1x128xi1> to vector<1x128xi1>
    %30 = vector.broadcast %29 : vector<1x128xi1> to vector<8x128xi1>
    %31 = arith.select %30, %23, %28 : vector<8x128xi1>, vector<8x128xf32>
    %32 = vector.extract_strided_slice %31 {offsets = [0, 0], sizes = [8, 32], strides = [1, 1]} : vector<8x128xf32> to vector<8x32xf32>
    %33 = vector.extract_strided_slice %31 {offsets = [0, 32], sizes = [8, 32], strides = [1, 1]} : vector<8x128xf32> to vector<8x32xf32>
    %34 = vector.extract_strided_slice %31 {offsets = [0, 64], sizes = [8, 32], strides = [1, 1]} : vector<8x128xf32> to vector<8x32xf32>
    %35 = vector.extract_strided_slice %31 {offsets = [0, 96], sizes = [8, 32], strides = [1, 1]} : vector<8x128xf32> to vector<8x32xf32>
    %36 = arith.mulf %33, %16 : vector<8x32xf32>
    %37 = arith.mulf %32, %34 : vector<8x32xf32>
    %38 = arith.addf %36, %37 : vector<8x32xf32>
    %39 = math.tanh %38 : vector<8x32xf32>
    %40 = arith.mulf %35, %39 : vector<8x32xf32>
    %41 = arith.truncf %40 : vector<8x32xf32> to vector<8x32xbf16>
    %42 = arith.index_cast %c0_i32 : i32 to index
    %c0_16 = arith.constant 0 : index
    %c0_17 = arith.constant 0 : index
    %43 = vector.load %arg12[%42, %c0_16, %c0_17] : memref<8x8x32xbf16, #tpu.memory_space<vmem>>, vector<1x8x32xbf16>
    %44 = vector.shape_cast %43 : vector<1x8x32xbf16> to vector<8x32xbf16>
    %45 = vector.shape_cast %41 : vector<8x32xbf16> to vector<1x8x32xbf16>
    tpu.vector_store %arg12[%42, %c0_16, %c0_17], %45 {strides = array<i32>} : memref<8x8x32xbf16, #tpu.memory_space<vmem>>, vector<1x8x32xbf16>,
    %c1_i32 = arith.constant 1 : i32
    %46 = arith.index_cast %c1_i32 : i32 to index
    %c0_18 = arith.constant 0 : index
    %c0_19 = arith.constant 0 : index
    %47 = vector.load %arg11[%46, %c0_18, %c0_19] : memref<8x8x128xf32, #tpu.memory_space<vmem>>, vector<1x8x128xf32>
    %48 = vector.shape_cast %47 : vector<1x8x128xf32> to vector<8x128xf32>
    %49 = arith.truncf %40 : vector<8x32xf32> to vector<8x32xbf16>
    %cst_20 = arith.constant dense<0.000000e+00> : vector<8x128xf32>
    %50 = tpu.matmul %49, %7, %cst_20 {dimension_numbers = #tpu.dot_dimension_numbers<[1], [0], [0], [1], [0, 0, 1, 1], [], []>} : vector<8x32xbf16>, vector<32x128xbf16>, vector<8x128xf32> -> vector<8x128xf32>
    %51 = arith.addf %48, %50 : vector<8x128xf32>
    %52 = math.tanh %51 : vector<8x128xf32>
    %53 = arith.negf %51 : vector<8x128xf32>
    %54 = math.exp %53 : vector<8x128xf32>
    %cst_21 = arith.constant 1.000000e+00 : f32
    %55 = vector.broadcast %cst_21 : f32 to vector<8x128xf32>
    %56 = arith.addf %55, %54 : vector<8x128xf32>
    %57 = arith.divf %55, %56 : vector<8x128xf32>
    %58 = vector.shape_cast %5 : vector<1x128xi1> to vector<1x128xi1>
    %59 = vector.broadcast %58 : vector<1x128xi1> to vector<8x128xi1>
    %60 = arith.select %59, %52, %57 : vector<8x128xi1>, vector<8x128xf32>
    %61 = vector.extract_strided_slice %60 {offsets = [0, 0], sizes = [8, 32], strides = [1, 1]} : vector<8x128xf32> to vector<8x32xf32>
    %62 = vector.extract_strided_slice %60 {offsets = [0, 32], sizes = [8, 32], strides = [1, 1]} : vector<8x128xf32> to vector<8x32xf32>
    %63 = vector.extract_strided_slice %60 {offsets = [0, 64], sizes = [8, 32], strides = [1, 1]} : vector<8x128xf32> to vector<8x32xf32>
    %64 = vector.extract_strided_slice %60 {offsets = [0, 96], sizes = [8, 32], strides = [1, 1]} : vector<8x128xf32> to vector<8x32xf32>
    %65 = arith.mulf %62, %38 : vector<8x32xf32>
    %66 = arith.mulf %61, %63 : vector<8x32xf32>
    %67 = arith.addf %65, %66 : vector<8x32xf32>
    %68 = math.tanh %67 : vector<8x32xf32>
    %69 = arith.mulf %64, %68 : vector<8x32xf32>
    %70 = arith.truncf %69 : vector<8x32xf32> to vector<8x32xbf16>
    %71 = arith.index_cast %c1_i32 : i32 to index
    %c0_22 = arith.constant 0 : index
    %c0_23 = arith.constant 0 : index
    %72 = vector.load %arg12[%71, %c0_22, %c0_23] : memref<8x8x32xbf16, #tpu.memory_space<vmem>>, vector<1x8x32xbf16>
    %73 = vector.shape_cast %72 : vector<1x8x32xbf16> to vector<8x32xbf16>
    %74 = vector.shape_cast %70 : vector<8x32xbf16> to vector<1x8x32xbf16>
    tpu.vector_store %arg12[%71, %c0_22, %c0_23], %74 {strides = array<i32>} : memref<8x8x32xbf16, #tpu.memory_space<vmem>>, vector<1x8x32xbf16>,
    %c2_i32 = arith.constant 2 : i32
    %75 = arith.index_cast %c2_i32 : i32 to index
    %c0_24 = arith.constant 0 : index
    %c0_25 = arith.constant 0 : index
    %76 = vector.load %arg11[%75, %c0_24, %c0_25] : memref<8x8x128xf32, #tpu.memory_space<vmem>>, vector<1x8x128xf32>
    %77 = vector.shape_cast %76 : vector<1x8x128xf32> to vector<8x128xf32>
    %78 = arith.truncf %69 : vector<8x32xf32> to vector<8x32xbf16>
    %cst_26 = arith.constant dense<0.000000e+00> : vector<8x128xf32>
    %79 = tpu.matmul %78, %7, %cst_26 {dimension_numbers = #tpu.dot_dimension_numbers<[1], [0], [0], [1], [0, 0, 1, 1], [], []>} : vector<8x32xbf16>, vector<32x128xbf16>, vector<8x128xf32> -> vector<8x128xf32>
    %80 = arith.addf %77, %79 : vector<8x128xf32>
    %81 = math.tanh %80 : vector<8x128xf32>
    %82 = arith.negf %80 : vector<8x128xf32>
    %83 = math.exp %82 : vector<8x128xf32>
    %cst_27 = arith.constant 1.000000e+00 : f32
    %84 = vector.broadcast %cst_27 : f32 to vector<8x128xf32>
    %85 = arith.addf %84, %83 : vector<8x128xf32>
    %86 = arith.divf %84, %85 : vector<8x128xf32>
    %87 = vector.shape_cast %5 : vector<1x128xi1> to vector<1x128xi1>
    %88 = vector.broadcast %87 : vector<1x128xi1> to vector<8x128xi1>
    %89 = arith.select %88, %81, %86 : vector<8x128xi1>, vector<8x128xf32>
    %90 = vector.extract_strided_slice %89 {offsets = [0, 0], sizes = [8, 32], strides = [1, 1]} : vector<8x128xf32> to vector<8x32xf32>
    %91 = vector.extract_strided_slice %89 {offsets = [0, 32], sizes = [8, 32], strides = [1, 1]} : vector<8x128xf32> to vector<8x32xf32>
    %92 = vector.extract_strided_slice %89 {offsets = [0, 64], sizes = [8, 32], strides = [1, 1]} : vector<8x128xf32> to vector<8x32xf32>
    %93 = vector.extract_strided_slice %89 {offsets = [0, 96], sizes = [8, 32], strides = [1, 1]} : vector<8x128xf32> to vector<8x32xf32>
    %94 = arith.mulf %91, %67 : vector<8x32xf32>
    %95 = arith.mulf %90, %92 : vector<8x32xf32>
    %96 = arith.addf %94, %95 : vector<8x32xf32>
    %97 = math.tanh %96 : vector<8x32xf32>
    %98 = arith.mulf %93, %97 : vector<8x32xf32>
    %99 = arith.truncf %98 : vector<8x32xf32> to vector<8x32xbf16>
    %100 = arith.index_cast %c2_i32 : i32 to index
    %c0_28 = arith.constant 0 : index
    %c0_29 = arith.constant 0 : index
    %101 = vector.load %arg12[%100, %c0_28, %c0_29] : memref<8x8x32xbf16, #tpu.memory_space<vmem>>, vector<1x8x32xbf16>
    %102 = vector.shape_cast %101 : vector<1x8x32xbf16> to vector<8x32xbf16>
    %103 = vector.shape_cast %99 : vector<8x32xbf16> to vector<1x8x32xbf16>
    tpu.vector_store %arg12[%100, %c0_28, %c0_29], %103 {strides = array<i32>} : memref<8x8x32xbf16, #tpu.memory_space<vmem>>, vector<1x8x32xbf16>,
    %c3_i32 = arith.constant 3 : i32
    %104 = arith.index_cast %c3_i32 : i32 to index
    %c0_30 = arith.constant 0 : index
    %c0_31 = arith.constant 0 : index
    %105 = vector.load %arg11[%104, %c0_30, %c0_31] : memref<8x8x128xf32, #tpu.memory_space<vmem>>, vector<1x8x128xf32>
    %106 = vector.shape_cast %105 : vector<1x8x128xf32> to vector<8x128xf32>
    %107 = arith.truncf %98 : vector<8x32xf32> to vector<8x32xbf16>
    %cst_32 = arith.constant dense<0.000000e+00> : vector<8x128xf32>
    %108 = tpu.matmul %107, %7, %cst_32 {dimension_numbers = #tpu.dot_dimension_numbers<[1], [0], [0], [1], [0, 0, 1, 1], [], []>} : vector<8x32xbf16>, vector<32x128xbf16>, vector<8x128xf32> -> vector<8x128xf32>
    %109 = arith.addf %106, %108 : vector<8x128xf32>
    %110 = math.tanh %109 : vector<8x128xf32>
    %111 = arith.negf %109 : vector<8x128xf32>
    %112 = math.exp %111 : vector<8x128xf32>
    %cst_33 = arith.constant 1.000000e+00 : f32
    %113 = vector.broadcast %cst_33 : f32 to vector<8x128xf32>
    %114 = arith.addf %113, %112 : vector<8x128xf32>
    %115 = arith.divf %113, %114 : vector<8x128xf32>
    %116 = vector.shape_cast %5 : vector<1x128xi1> to vector<1x128xi1>
    %117 = vector.broadcast %116 : vector<1x128xi1> to vector<8x128xi1>
    %118 = arith.select %117, %110, %115 : vector<8x128xi1>, vector<8x128xf32>
    %119 = vector.extract_strided_slice %118 {offsets = [0, 0], sizes = [8, 32], strides = [1, 1]} : vector<8x128xf32> to vector<8x32xf32>
    %120 = vector.extract_strided_slice %118 {offsets = [0, 32], sizes = [8, 32], strides = [1, 1]} : vector<8x128xf32> to vector<8x32xf32>
    %121 = vector.extract_strided_slice %118 {offsets = [0, 64], sizes = [8, 32], strides = [1, 1]} : vector<8x128xf32> to vector<8x32xf32>
    %122 = vector.extract_strided_slice %118 {offsets = [0, 96], sizes = [8, 32], strides = [1, 1]} : vector<8x128xf32> to vector<8x32xf32>
    %123 = arith.mulf %120, %96 : vector<8x32xf32>
    %124 = arith.mulf %119, %121 : vector<8x32xf32>
    %125 = arith.addf %123, %124 : vector<8x32xf32>
    %126 = math.tanh %125 : vector<8x32xf32>
    %127 = arith.mulf %122, %126 : vector<8x32xf32>
    %128 = arith.truncf %127 : vector<8x32xf32> to vector<8x32xbf16>
    %129 = arith.index_cast %c3_i32 : i32 to index
    %c0_34 = arith.constant 0 : index
    %c0_35 = arith.constant 0 : index
    %130 = vector.load %arg12[%129, %c0_34, %c0_35] : memref<8x8x32xbf16, #tpu.memory_space<vmem>>, vector<1x8x32xbf16>
    %131 = vector.shape_cast %130 : vector<1x8x32xbf16> to vector<8x32xbf16>
    %132 = vector.shape_cast %128 : vector<8x32xbf16> to vector<1x8x32xbf16>
    tpu.vector_store %arg12[%129, %c0_34, %c0_35], %132 {strides = array<i32>} : memref<8x8x32xbf16, #tpu.memory_space<vmem>>, vector<1x8x32xbf16>,
    %c4_i32 = arith.constant 4 : i32
    %133 = arith.index_cast %c4_i32 : i32 to index
    %c0_36 = arith.constant 0 : index
    %c0_37 = arith.constant 0 : index
    %134 = vector.load %arg11[%133, %c0_36, %c0_37] : memref<8x8x128xf32, #tpu.memory_space<vmem>>, vector<1x8x128xf32>
    %135 = vector.shape_cast %134 : vector<1x8x128xf32> to vector<8x128xf32>
    %136 = arith.truncf %127 : vector<8x32xf32> to vector<8x32xbf16>
    %cst_38 = arith.constant dense<0.000000e+00> : vector<8x128xf32>
    %137 = tpu.matmul %136, %7, %cst_38 {dimension_numbers = #tpu.dot_dimension_numbers<[1], [0], [0], [1], [0, 0, 1, 1], [], []>} : vector<8x32xbf16>, vector<32x128xbf16>, vector<8x128xf32> -> vector<8x128xf32>
    %138 = arith.addf %135, %137 : vector<8x128xf32>
    %139 = math.tanh %138 : vector<8x128xf32>
    %140 = arith.negf %138 : vector<8x128xf32>
    %141 = math.exp %140 : vector<8x128xf32>
    %cst_39 = arith.constant 1.000000e+00 : f32
    %142 = vector.broadcast %cst_39 : f32 to vector<8x128xf32>
    %143 = arith.addf %142, %141 : vector<8x128xf32>
    %144 = arith.divf %142, %143 : vector<8x128xf32>
    %145 = vector.shape_cast %5 : vector<1x128xi1> to vector<1x128xi1>
    %146 = vector.broadcast %145 : vector<1x128xi1> to vector<8x128xi1>
    %147 = arith.select %146, %139, %144 : vector<8x128xi1>, vector<8x128xf32>
    %148 = vector.extract_strided_slice %147 {offsets = [0, 0], sizes = [8, 32], strides = [1, 1]} : vector<8x128xf32> to vector<8x32xf32>
    %149 = vector.extract_strided_slice %147 {offsets = [0, 32], sizes = [8, 32], strides = [1, 1]} : vector<8x128xf32> to vector<8x32xf32>
    %150 = vector.extract_strided_slice %147 {offsets = [0, 64], sizes = [8, 32], strides = [1, 1]} : vector<8x128xf32> to vector<8x32xf32>
    %151 = vector.extract_strided_slice %147 {offsets = [0, 96], sizes = [8, 32], strides = [1, 1]} : vector<8x128xf32> to vector<8x32xf32>
    %152 = arith.mulf %149, %125 : vector<8x32xf32>
    %153 = arith.mulf %148, %150 : vector<8x32xf32>
    %154 = arith.addf %152, %153 : vector<8x32xf32>
    %155 = math.tanh %154 : vector<8x32xf32>
    %156 = arith.mulf %151, %155 : vector<8x32xf32>
    %157 = arith.truncf %156 : vector<8x32xf32> to vector<8x32xbf16>
    %158 = arith.index_cast %c4_i32 : i32 to index
    %c0_40 = arith.constant 0 : index
    %c0_41 = arith.constant 0 : index
    %159 = vector.load %arg12[%158, %c0_40, %c0_41] : memref<8x8x32xbf16, #tpu.memory_space<vmem>>, vector<1x8x32xbf16>
    %160 = vector.shape_cast %159 : vector<1x8x32xbf16> to vector<8x32xbf16>
    %161 = vector.shape_cast %157 : vector<8x32xbf16> to vector<1x8x32xbf16>
    tpu.vector_store %arg12[%158, %c0_40, %c0_41], %161 {strides = array<i32>} : memref<8x8x32xbf16, #tpu.memory_space<vmem>>, vector<1x8x32xbf16>,
    %c5_i32 = arith.constant 5 : i32
    %162 = arith.index_cast %c5_i32 : i32 to index
    %c0_42 = arith.constant 0 : index
    %c0_43 = arith.constant 0 : index
    %163 = vector.load %arg11[%162, %c0_42, %c0_43] : memref<8x8x128xf32, #tpu.memory_space<vmem>>, vector<1x8x128xf32>
    %164 = vector.shape_cast %163 : vector<1x8x128xf32> to vector<8x128xf32>
    %165 = arith.truncf %156 : vector<8x32xf32> to vector<8x32xbf16>
    %cst_44 = arith.constant dense<0.000000e+00> : vector<8x128xf32>
    %166 = tpu.matmul %165, %7, %cst_44 {dimension_numbers = #tpu.dot_dimension_numbers<[1], [0], [0], [1], [0, 0, 1, 1], [], []>} : vector<8x32xbf16>, vector<32x128xbf16>, vector<8x128xf32> -> vector<8x128xf32>
    %167 = arith.addf %164, %166 : vector<8x128xf32>
    %168 = math.tanh %167 : vector<8x128xf32>
    %169 = arith.negf %167 : vector<8x128xf32>
    %170 = math.exp %169 : vector<8x128xf32>
    %cst_45 = arith.constant 1.000000e+00 : f32
    %171 = vector.broadcast %cst_45 : f32 to vector<8x128xf32>
    %172 = arith.addf %171, %170 : vector<8x128xf32>
    %173 = arith.divf %171, %172 : vector<8x128xf32>
    %174 = vector.shape_cast %5 : vector<1x128xi1> to vector<1x128xi1>
    %175 = vector.broadcast %174 : vector<1x128xi1> to vector<8x128xi1>
    %176 = arith.select %175, %168, %173 : vector<8x128xi1>, vector<8x128xf32>
    %177 = vector.extract_strided_slice %176 {offsets = [0, 0], sizes = [8, 32], strides = [1, 1]} : vector<8x128xf32> to vector<8x32xf32>
    %178 = vector.extract_strided_slice %176 {offsets = [0, 32], sizes = [8, 32], strides = [1, 1]} : vector<8x128xf32> to vector<8x32xf32>
    %179 = vector.extract_strided_slice %176 {offsets = [0, 64], sizes = [8, 32], strides = [1, 1]} : vector<8x128xf32> to vector<8x32xf32>
    %180 = vector.extract_strided_slice %176 {offsets = [0, 96], sizes = [8, 32], strides = [1, 1]} : vector<8x128xf32> to vector<8x32xf32>
    %181 = arith.mulf %178, %154 : vector<8x32xf32>
    %182 = arith.mulf %177, %179 : vector<8x32xf32>
    %183 = arith.addf %181, %182 : vector<8x32xf32>
    %184 = math.tanh %183 : vector<8x32xf32>
    %185 = arith.mulf %180, %184 : vector<8x32xf32>
    %186 = arith.truncf %185 : vector<8x32xf32> to vector<8x32xbf16>
    %187 = arith.index_cast %c5_i32 : i32 to index
    %c0_46 = arith.constant 0 : index
    %c0_47 = arith.constant 0 : index
    %188 = vector.load %arg12[%187, %c0_46, %c0_47] : memref<8x8x32xbf16, #tpu.memory_space<vmem>>, vector<1x8x32xbf16>
    %189 = vector.shape_cast %188 : vector<1x8x32xbf16> to vector<8x32xbf16>
    %190 = vector.shape_cast %186 : vector<8x32xbf16> to vector<1x8x32xbf16>
    tpu.vector_store %arg12[%187, %c0_46, %c0_47], %190 {strides = array<i32>} : memref<8x8x32xbf16, #tpu.memory_space<vmem>>, vector<1x8x32xbf16>,
    %c6_i32 = arith.constant 6 : i32
    %191 = arith.index_cast %c6_i32 : i32 to index
    %c0_48 = arith.constant 0 : index
    %c0_49 = arith.constant 0 : index
    %192 = vector.load %arg11[%191, %c0_48, %c0_49] : memref<8x8x128xf32, #tpu.memory_space<vmem>>, vector<1x8x128xf32>
    %193 = vector.shape_cast %192 : vector<1x8x128xf32> to vector<8x128xf32>
    %194 = arith.truncf %185 : vector<8x32xf32> to vector<8x32xbf16>
    %cst_50 = arith.constant dense<0.000000e+00> : vector<8x128xf32>
    %195 = tpu.matmul %194, %7, %cst_50 {dimension_numbers = #tpu.dot_dimension_numbers<[1], [0], [0], [1], [0, 0, 1, 1], [], []>} : vector<8x32xbf16>, vector<32x128xbf16>, vector<8x128xf32> -> vector<8x128xf32>
    %196 = arith.addf %193, %195 : vector<8x128xf32>
    %197 = math.tanh %196 : vector<8x128xf32>
    %198 = arith.negf %196 : vector<8x128xf32>
    %199 = math.exp %198 : vector<8x128xf32>
    %cst_51 = arith.constant 1.000000e+00 : f32
    %200 = vector.broadcast %cst_51 : f32 to vector<8x128xf32>
    %201 = arith.addf %200, %199 : vector<8x128xf32>
    %202 = arith.divf %200, %201 : vector<8x128xf32>
    %203 = vector.shape_cast %5 : vector<1x128xi1> to vector<1x128xi1>
    %204 = vector.broadcast %203 : vector<1x128xi1> to vector<8x128xi1>
    %205 = arith.select %204, %197, %202 : vector<8x128xi1>, vector<8x128xf32>
    %206 = vector.extract_strided_slice %205 {offsets = [0, 0], sizes = [8, 32], strides = [1, 1]} : vector<8x128xf32> to vector<8x32xf32>
    %207 = vector.extract_strided_slice %205 {offsets = [0, 32], sizes = [8, 32], strides = [1, 1]} : vector<8x128xf32> to vector<8x32xf32>
    %208 = vector.extract_strided_slice %205 {offsets = [0, 64], sizes = [8, 32], strides = [1, 1]} : vector<8x128xf32> to vector<8x32xf32>
    %209 = vector.extract_strided_slice %205 {offsets = [0, 96], sizes = [8, 32], strides = [1, 1]} : vector<8x128xf32> to vector<8x32xf32>
    %210 = arith.mulf %207, %183 : vector<8x32xf32>
    %211 = arith.mulf %206, %208 : vector<8x32xf32>
    %212 = arith.addf %210, %211 : vector<8x32xf32>
    %213 = math.tanh %212 : vector<8x32xf32>
    %214 = arith.mulf %209, %213 : vector<8x32xf32>
    %215 = arith.truncf %214 : vector<8x32xf32> to vector<8x32xbf16>
    %216 = arith.index_cast %c6_i32 : i32 to index
    %c0_52 = arith.constant 0 : index
    %c0_53 = arith.constant 0 : index
    %217 = vector.load %arg12[%216, %c0_52, %c0_53] : memref<8x8x32xbf16, #tpu.memory_space<vmem>>, vector<1x8x32xbf16>
    %218 = vector.shape_cast %217 : vector<1x8x32xbf16> to vector<8x32xbf16>
    %219 = vector.shape_cast %215 : vector<8x32xbf16> to vector<1x8x32xbf16>
    tpu.vector_store %arg12[%216, %c0_52, %c0_53], %219 {strides = array<i32>} : memref<8x8x32xbf16, #tpu.memory_space<vmem>>, vector<1x8x32xbf16>,
    %c7_i32 = arith.constant 7 : i32
    %220 = arith.index_cast %c7_i32 : i32 to index
    %c0_54 = arith.constant 0 : index
    %c0_55 = arith.constant 0 : index
    %221 = vector.load %arg11[%220, %c0_54, %c0_55] : memref<8x8x128xf32, #tpu.memory_space<vmem>>, vector<1x8x128xf32>
    %222 = vector.shape_cast %221 : vector<1x8x128xf32> to vector<8x128xf32>
    %223 = arith.truncf %214 : vector<8x32xf32> to vector<8x32xbf16>
    %cst_56 = arith.constant dense<0.000000e+00> : vector<8x128xf32>
    %224 = tpu.matmul %223, %7, %cst_56 {dimension_numbers = #tpu.dot_dimension_numbers<[1], [0], [0], [1], [0, 0, 1, 1], [], []>} : vector<8x32xbf16>, vector<32x128xbf16>, vector<8x128xf32> -> vector<8x128xf32>
    %225 = arith.addf %222, %224 : vector<8x128xf32>
    %226 = math.tanh %225 : vector<8x128xf32>
    %227 = arith.negf %225 : vector<8x128xf32>
    %228 = math.exp %227 : vector<8x128xf32>
    %cst_57 = arith.constant 1.000000e+00 : f32
    %229 = vector.broadcast %cst_57 : f32 to vector<8x128xf32>
    %230 = arith.addf %229, %228 : vector<8x128xf32>
    %231 = arith.divf %229, %230 : vector<8x128xf32>
    %232 = vector.shape_cast %5 : vector<1x128xi1> to vector<1x128xi1>
    %233 = vector.broadcast %232 : vector<1x128xi1> to vector<8x128xi1>
    %234 = arith.select %233, %226, %231 : vector<8x128xi1>, vector<8x128xf32>
    %235 = vector.extract_strided_slice %234 {offsets = [0, 0], sizes = [8, 32], strides = [1, 1]} : vector<8x128xf32> to vector<8x32xf32>
    %236 = vector.extract_strided_slice %234 {offsets = [0, 32], sizes = [8, 32], strides = [1, 1]} : vector<8x128xf32> to vector<8x32xf32>
    %237 = vector.extract_strided_slice %234 {offsets = [0, 64], sizes = [8, 32], strides = [1, 1]} : vector<8x128xf32> to vector<8x32xf32>
    %238 = vector.extract_strided_slice %234 {offsets = [0, 96], sizes = [8, 32], strides = [1, 1]} : vector<8x128xf32> to vector<8x32xf32>
    %239 = arith.mulf %236, %212 : vector<8x32xf32>
    %240 = arith.mulf %235, %237 : vector<8x32xf32>
    %241 = arith.addf %239, %240 : vector<8x32xf32>
    %242 = math.tanh %241 : vector<8x32xf32>
    %243 = arith.mulf %238, %242 : vector<8x32xf32>
    %244 = arith.truncf %243 : vector<8x32xf32> to vector<8x32xbf16>
    %245 = arith.index_cast %c7_i32 : i32 to index
    %c0_58 = arith.constant 0 : index
    %c0_59 = arith.constant 0 : index
    %246 = vector.load %arg12[%245, %c0_58, %c0_59] : memref<8x8x32xbf16, #tpu.memory_space<vmem>>, vector<1x8x32xbf16>
    %247 = vector.shape_cast %246 : vector<1x8x32xbf16> to vector<8x32xbf16>
    %248 = vector.shape_cast %244 : vector<8x32xbf16> to vector<1x8x32xbf16>
    tpu.vector_store %arg12[%245, %c0_58, %c0_59], %248 {strides = array<i32>} : memref<8x8x32xbf16, #tpu.memory_space<vmem>>, vector<1x8x32xbf16>,
    %c8_i32 = arith.constant 8 : i32
    %c0_60 = arith.constant 0 : index
    %c0_61 = arith.constant 0 : index
    %249 = vector.load %arg5[%c0_60, %c0_61] : memref<32x128xbf16, #tpu.memory_space<vmem>>, vector<32x128xbf16>
    %c0_62 = arith.constant 0 : index
    %c0_63 = arith.constant 0 : index
    %250 = vector.load %arg6[%c0_62, %c0_63] : memref<32x128xbf16, #tpu.memory_space<vmem>>, vector<32x128xbf16>
    %c0_64 = arith.constant 0 : index
    %c0_65 = arith.constant 0 : index
    %251 = vector.load %arg7[%c0_64, %c0_65] : memref<1x128xf32, #tpu.memory_space<vmem>>, vector<1x128xf32>
    %c0_66 = arith.constant 0 : index
    %c0_67 = arith.constant 0 : index
    %c0_68 = arith.constant 0 : index
    %252 = vector.load %arg12[%c0_66, %c0_67, %c0_68] : memref<8x8x32xbf16, #tpu.memory_space<vmem>>, vector<8x8x32xbf16>
    %253 = vector.shape_cast %252 : vector<8x8x32xbf16> to vector<64x32xbf16>
    %cst_69 = arith.constant dense<0.000000e+00> : vector<64x128xf32>
    %254 = tpu.matmul %253, %249, %cst_69 {dimension_numbers = #tpu.dot_dimension_numbers<[1], [0], [0], [1], [0, 0, 1, 1], [], []>} : vector<64x32xbf16>, vector<32x128xbf16>, vector<64x128xf32> -> vector<64x128xf32>
    %255 = vector.broadcast %251 : vector<1x128xf32> to vector<64x128xf32>
    %256 = arith.addf %254, %255 : vector<64x128xf32>
    %257 = vector.shape_cast %256 : vector<64x128xf32> to vector<8x8x128xf32>
    %c0_70 = arith.constant 0 : index
    %c0_71 = arith.constant 0 : index
    %c0_72 = arith.constant 0 : index
    %258 = vector.load %arg11[%c0_70, %c0_71, %c0_72] : memref<8x8x128xf32, #tpu.memory_space<vmem>>, vector<8x8x128xf32>
    tpu.vector_store %arg11[%c0_70, %c0_71, %c0_72], %257 {strides = array<i32>} : memref<8x8x128xf32, #tpu.memory_space<vmem>>, vector<8x8x128xf32>,
    %cst_73 = arith.constant 0.000000e+00 : f32
    %259 = vector.broadcast %cst_73 : f32 to vector<8x32xf32>
    %c0_i32_74 = arith.constant 0 : i32
    %260 = arith.index_cast %c0_i32_74 : i32 to index
    %c0_75 = arith.constant 0 : index
    %c0_76 = arith.constant 0 : index
    %261 = vector.load %arg11[%260, %c0_75, %c0_76] : memref<8x8x128xf32, #tpu.memory_space<vmem>>, vector<1x8x128xf32>
    %262 = vector.shape_cast %261 : vector<1x8x128xf32> to vector<8x128xf32>
    %263 = arith.truncf %259 : vector<8x32xf32> to vector<8x32xbf16>
    %cst_77 = arith.constant dense<0.000000e+00> : vector<8x128xf32>
    %264 = tpu.matmul %263, %250, %cst_77 {dimension_numbers = #tpu.dot_dimension_numbers<[1], [0], [0], [1], [0, 0, 1, 1], [], []>} : vector<8x32xbf16>, vector<32x128xbf16>, vector<8x128xf32> -> vector<8x128xf32>
    %265 = arith.addf %262, %264 : vector<8x128xf32>
    %266 = math.tanh %265 : vector<8x128xf32>
    %267 = arith.negf %265 : vector<8x128xf32>
    %268 = math.exp %267 : vector<8x128xf32>
    %cst_78 = arith.constant 1.000000e+00 : f32
    %269 = vector.broadcast %cst_78 : f32 to vector<8x128xf32>
    %270 = arith.addf %269, %268 : vector<8x128xf32>
    %271 = arith.divf %269, %270 : vector<8x128xf32>
    %272 = vector.shape_cast %5 : vector<1x128xi1> to vector<1x128xi1>
    %273 = vector.broadcast %272 : vector<1x128xi1> to vector<8x128xi1>
    %274 = arith.select %273, %266, %271 : vector<8x128xi1>, vector<8x128xf32>
    %275 = vector.extract_strided_slice %274 {offsets = [0, 0], sizes = [8, 32], strides = [1, 1]} : vector<8x128xf32> to vector<8x32xf32>
    %276 = vector.extract_strided_slice %274 {offsets = [0, 32], sizes = [8, 32], strides = [1, 1]} : vector<8x128xf32> to vector<8x32xf32>
    %277 = vector.extract_strided_slice %274 {offsets = [0, 64], sizes = [8, 32], strides = [1, 1]} : vector<8x128xf32> to vector<8x32xf32>
    %278 = vector.extract_strided_slice %274 {offsets = [0, 96], sizes = [8, 32], strides = [1, 1]} : vector<8x128xf32> to vector<8x32xf32>
    %279 = arith.mulf %276, %259 : vector<8x32xf32>
    %280 = arith.mulf %275, %277 : vector<8x32xf32>
    %281 = arith.addf %279, %280 : vector<8x32xf32>
    %282 = math.tanh %281 : vector<8x32xf32>
    %283 = arith.mulf %278, %282 : vector<8x32xf32>
    %c1_i32_79 = arith.constant 1 : i32
    %284 = arith.index_cast %c1_i32_79 : i32 to index
    %c0_80 = arith.constant 0 : index
    %c0_81 = arith.constant 0 : index
    %285 = vector.load %arg11[%284, %c0_80, %c0_81] : memref<8x8x128xf32, #tpu.memory_space<vmem>>, vector<1x8x128xf32>
    %286 = vector.shape_cast %285 : vector<1x8x128xf32> to vector<8x128xf32>
    %287 = arith.truncf %283 : vector<8x32xf32> to vector<8x32xbf16>
    %cst_82 = arith.constant dense<0.000000e+00> : vector<8x128xf32>
    %288 = tpu.matmul %287, %250, %cst_82 {dimension_numbers = #tpu.dot_dimension_numbers<[1], [0], [0], [1], [0, 0, 1, 1], [], []>} : vector<8x32xbf16>, vector<32x128xbf16>, vector<8x128xf32> -> vector<8x128xf32>
    %289 = arith.addf %286, %288 : vector<8x128xf32>
    %290 = math.tanh %289 : vector<8x128xf32>
    %291 = arith.negf %289 : vector<8x128xf32>
    %292 = math.exp %291 : vector<8x128xf32>
    %cst_83 = arith.constant 1.000000e+00 : f32
    %293 = vector.broadcast %cst_83 : f32 to vector<8x128xf32>
    %294 = arith.addf %293, %292 : vector<8x128xf32>
    %295 = arith.divf %293, %294 : vector<8x128xf32>
    %296 = vector.shape_cast %5 : vector<1x128xi1> to vector<1x128xi1>
    %297 = vector.broadcast %296 : vector<1x128xi1> to vector<8x128xi1>
    %298 = arith.select %297, %290, %295 : vector<8x128xi1>, vector<8x128xf32>
    %299 = vector.extract_strided_slice %298 {offsets = [0, 0], sizes = [8, 32], strides = [1, 1]} : vector<8x128xf32> to vector<8x32xf32>
    %300 = vector.extract_strided_slice %298 {offsets = [0, 32], sizes = [8, 32], strides = [1, 1]} : vector<8x128xf32> to vector<8x32xf32>
    %301 = vector.extract_strided_slice %298 {offsets = [0, 64], sizes = [8, 32], strides = [1, 1]} : vector<8x128xf32> to vector<8x32xf32>
    %302 = vector.extract_strided_slice %298 {offsets = [0, 96], sizes = [8, 32], strides = [1, 1]} : vector<8x128xf32> to vector<8x32xf32>
    %303 = arith.mulf %300, %281 : vector<8x32xf32>
    %304 = arith.mulf %299, %301 : vector<8x32xf32>
    %305 = arith.addf %303, %304 : vector<8x32xf32>
    %306 = math.tanh %305 : vector<8x32xf32>
    %307 = arith.mulf %302, %306 : vector<8x32xf32>
    %c2_i32_84 = arith.constant 2 : i32
    %308 = arith.index_cast %c2_i32_84 : i32 to index
    %c0_85 = arith.constant 0 : index
    %c0_86 = arith.constant 0 : index
    %309 = vector.load %arg11[%308, %c0_85, %c0_86] : memref<8x8x128xf32, #tpu.memory_space<vmem>>, vector<1x8x128xf32>
    %310 = vector.shape_cast %309 : vector<1x8x128xf32> to vector<8x128xf32>
    %311 = arith.truncf %307 : vector<8x32xf32> to vector<8x32xbf16>
    %cst_87 = arith.constant dense<0.000000e+00> : vector<8x128xf32>
    %312 = tpu.matmul %311, %250, %cst_87 {dimension_numbers = #tpu.dot_dimension_numbers<[1], [0], [0], [1], [0, 0, 1, 1], [], []>} : vector<8x32xbf16>, vector<32x128xbf16>, vector<8x128xf32> -> vector<8x128xf32>
    %313 = arith.addf %310, %312 : vector<8x128xf32>
    %314 = math.tanh %313 : vector<8x128xf32>
    %315 = arith.negf %313 : vector<8x128xf32>
    %316 = math.exp %315 : vector<8x128xf32>
    %cst_88 = arith.constant 1.000000e+00 : f32
    %317 = vector.broadcast %cst_88 : f32 to vector<8x128xf32>
    %318 = arith.addf %317, %316 : vector<8x128xf32>
    %319 = arith.divf %317, %318 : vector<8x128xf32>
    %320 = vector.shape_cast %5 : vector<1x128xi1> to vector<1x128xi1>
    %321 = vector.broadcast %320 : vector<1x128xi1> to vector<8x128xi1>
    %322 = arith.select %321, %314, %319 : vector<8x128xi1>, vector<8x128xf32>
    %323 = vector.extract_strided_slice %322 {offsets = [0, 0], sizes = [8, 32], strides = [1, 1]} : vector<8x128xf32> to vector<8x32xf32>
    %324 = vector.extract_strided_slice %322 {offsets = [0, 32], sizes = [8, 32], strides = [1, 1]} : vector<8x128xf32> to vector<8x32xf32>
    %325 = vector.extract_strided_slice %322 {offsets = [0, 64], sizes = [8, 32], strides = [1, 1]} : vector<8x128xf32> to vector<8x32xf32>
    %326 = vector.extract_strided_slice %322 {offsets = [0, 96], sizes = [8, 32], strides = [1, 1]} : vector<8x128xf32> to vector<8x32xf32>
    %327 = arith.mulf %324, %305 : vector<8x32xf32>
    %328 = arith.mulf %323, %325 : vector<8x32xf32>
    %329 = arith.addf %327, %328 : vector<8x32xf32>
    %330 = math.tanh %329 : vector<8x32xf32>
    %331 = arith.mulf %326, %330 : vector<8x32xf32>
    %c3_i32_89 = arith.constant 3 : i32
    %332 = arith.index_cast %c3_i32_89 : i32 to index
    %c0_90 = arith.constant 0 : index
    %c0_91 = arith.constant 0 : index
    %333 = vector.load %arg11[%332, %c0_90, %c0_91] : memref<8x8x128xf32, #tpu.memory_space<vmem>>, vector<1x8x128xf32>
    %334 = vector.shape_cast %333 : vector<1x8x128xf32> to vector<8x128xf32>
    %335 = arith.truncf %331 : vector<8x32xf32> to vector<8x32xbf16>
    %cst_92 = arith.constant dense<0.000000e+00> : vector<8x128xf32>
    %336 = tpu.matmul %335, %250, %cst_92 {dimension_numbers = #tpu.dot_dimension_numbers<[1], [0], [0], [1], [0, 0, 1, 1], [], []>} : vector<8x32xbf16>, vector<32x128xbf16>, vector<8x128xf32> -> vector<8x128xf32>
    %337 = arith.addf %334, %336 : vector<8x128xf32>
    %338 = math.tanh %337 : vector<8x128xf32>
    %339 = arith.negf %337 : vector<8x128xf32>
    %340 = math.exp %339 : vector<8x128xf32>
    %cst_93 = arith.constant 1.000000e+00 : f32
    %341 = vector.broadcast %cst_93 : f32 to vector<8x128xf32>
    %342 = arith.addf %341, %340 : vector<8x128xf32>
    %343 = arith.divf %341, %342 : vector<8x128xf32>
    %344 = vector.shape_cast %5 : vector<1x128xi1> to vector<1x128xi1>
    %345 = vector.broadcast %344 : vector<1x128xi1> to vector<8x128xi1>
    %346 = arith.select %345, %338, %343 : vector<8x128xi1>, vector<8x128xf32>
    %347 = vector.extract_strided_slice %346 {offsets = [0, 0], sizes = [8, 32], strides = [1, 1]} : vector<8x128xf32> to vector<8x32xf32>
    %348 = vector.extract_strided_slice %346 {offsets = [0, 32], sizes = [8, 32], strides = [1, 1]} : vector<8x128xf32> to vector<8x32xf32>
    %349 = vector.extract_strided_slice %346 {offsets = [0, 64], sizes = [8, 32], strides = [1, 1]} : vector<8x128xf32> to vector<8x32xf32>
    %350 = vector.extract_strided_slice %346 {offsets = [0, 96], sizes = [8, 32], strides = [1, 1]} : vector<8x128xf32> to vector<8x32xf32>
    %351 = arith.mulf %348, %329 : vector<8x32xf32>
    %352 = arith.mulf %347, %349 : vector<8x32xf32>
    %353 = arith.addf %351, %352 : vector<8x32xf32>
    %354 = math.tanh %353 : vector<8x32xf32>
    %355 = arith.mulf %350, %354 : vector<8x32xf32>
    %c4_i32_94 = arith.constant 4 : i32
    %356 = arith.index_cast %c4_i32_94 : i32 to index
    %c0_95 = arith.constant 0 : index
    %c0_96 = arith.constant 0 : index
    %357 = vector.load %arg11[%356, %c0_95, %c0_96] : memref<8x8x128xf32, #tpu.memory_space<vmem>>, vector<1x8x128xf32>
    %358 = vector.shape_cast %357 : vector<1x8x128xf32> to vector<8x128xf32>
    %359 = arith.truncf %355 : vector<8x32xf32> to vector<8x32xbf16>
    %cst_97 = arith.constant dense<0.000000e+00> : vector<8x128xf32>
    %360 = tpu.matmul %359, %250, %cst_97 {dimension_numbers = #tpu.dot_dimension_numbers<[1], [0], [0], [1], [0, 0, 1, 1], [], []>} : vector<8x32xbf16>, vector<32x128xbf16>, vector<8x128xf32> -> vector<8x128xf32>
    %361 = arith.addf %358, %360 : vector<8x128xf32>
    %362 = math.tanh %361 : vector<8x128xf32>
    %363 = arith.negf %361 : vector<8x128xf32>
    %364 = math.exp %363 : vector<8x128xf32>
    %cst_98 = arith.constant 1.000000e+00 : f32
    %365 = vector.broadcast %cst_98 : f32 to vector<8x128xf32>
    %366 = arith.addf %365, %364 : vector<8x128xf32>
    %367 = arith.divf %365, %366 : vector<8x128xf32>
    %368 = vector.shape_cast %5 : vector<1x128xi1> to vector<1x128xi1>
    %369 = vector.broadcast %368 : vector<1x128xi1> to vector<8x128xi1>
    %370 = arith.select %369, %362, %367 : vector<8x128xi1>, vector<8x128xf32>
    %371 = vector.extract_strided_slice %370 {offsets = [0, 0], sizes = [8, 32], strides = [1, 1]} : vector<8x128xf32> to vector<8x32xf32>
    %372 = vector.extract_strided_slice %370 {offsets = [0, 32], sizes = [8, 32], strides = [1, 1]} : vector<8x128xf32> to vector<8x32xf32>
    %373 = vector.extract_strided_slice %370 {offsets = [0, 64], sizes = [8, 32], strides = [1, 1]} : vector<8x128xf32> to vector<8x32xf32>
    %374 = vector.extract_strided_slice %370 {offsets = [0, 96], sizes = [8, 32], strides = [1, 1]} : vector<8x128xf32> to vector<8x32xf32>
    %375 = arith.mulf %372, %353 : vector<8x32xf32>
    %376 = arith.mulf %371, %373 : vector<8x32xf32>
    %377 = arith.addf %375, %376 : vector<8x32xf32>
    %378 = math.tanh %377 : vector<8x32xf32>
    %379 = arith.mulf %374, %378 : vector<8x32xf32>
    %c5_i32_99 = arith.constant 5 : i32
    %380 = arith.index_cast %c5_i32_99 : i32 to index
    %c0_100 = arith.constant 0 : index
    %c0_101 = arith.constant 0 : index
    %381 = vector.load %arg11[%380, %c0_100, %c0_101] : memref<8x8x128xf32, #tpu.memory_space<vmem>>, vector<1x8x128xf32>
    %382 = vector.shape_cast %381 : vector<1x8x128xf32> to vector<8x128xf32>
    %383 = arith.truncf %379 : vector<8x32xf32> to vector<8x32xbf16>
    %cst_102 = arith.constant dense<0.000000e+00> : vector<8x128xf32>
    %384 = tpu.matmul %383, %250, %cst_102 {dimension_numbers = #tpu.dot_dimension_numbers<[1], [0], [0], [1], [0, 0, 1, 1], [], []>} : vector<8x32xbf16>, vector<32x128xbf16>, vector<8x128xf32> -> vector<8x128xf32>
    %385 = arith.addf %382, %384 : vector<8x128xf32>
    %386 = math.tanh %385 : vector<8x128xf32>
    %387 = arith.negf %385 : vector<8x128xf32>
    %388 = math.exp %387 : vector<8x128xf32>
    %cst_103 = arith.constant 1.000000e+00 : f32
    %389 = vector.broadcast %cst_103 : f32 to vector<8x128xf32>
    %390 = arith.addf %389, %388 : vector<8x128xf32>
    %391 = arith.divf %389, %390 : vector<8x128xf32>
    %392 = vector.shape_cast %5 : vector<1x128xi1> to vector<1x128xi1>
    %393 = vector.broadcast %392 : vector<1x128xi1> to vector<8x128xi1>
    %394 = arith.select %393, %386, %391 : vector<8x128xi1>, vector<8x128xf32>
    %395 = vector.extract_strided_slice %394 {offsets = [0, 0], sizes = [8, 32], strides = [1, 1]} : vector<8x128xf32> to vector<8x32xf32>
    %396 = vector.extract_strided_slice %394 {offsets = [0, 32], sizes = [8, 32], strides = [1, 1]} : vector<8x128xf32> to vector<8x32xf32>
    %397 = vector.extract_strided_slice %394 {offsets = [0, 64], sizes = [8, 32], strides = [1, 1]} : vector<8x128xf32> to vector<8x32xf32>
    %398 = vector.extract_strided_slice %394 {offsets = [0, 96], sizes = [8, 32], strides = [1, 1]} : vector<8x128xf32> to vector<8x32xf32>
    %399 = arith.mulf %396, %377 : vector<8x32xf32>
    %400 = arith.mulf %395, %397 : vector<8x32xf32>
    %401 = arith.addf %399, %400 : vector<8x32xf32>
    %402 = math.tanh %401 : vector<8x32xf32>
    %403 = arith.mulf %398, %402 : vector<8x32xf32>
    %c6_i32_104 = arith.constant 6 : i32
    %404 = arith.index_cast %c6_i32_104 : i32 to index
    %c0_105 = arith.constant 0 : index
    %c0_106 = arith.constant 0 : index
    %405 = vector.load %arg11[%404, %c0_105, %c0_106] : memref<8x8x128xf32, #tpu.memory_space<vmem>>, vector<1x8x128xf32>
    %406 = vector.shape_cast %405 : vector<1x8x128xf32> to vector<8x128xf32>
    %407 = arith.truncf %403 : vector<8x32xf32> to vector<8x32xbf16>
    %cst_107 = arith.constant dense<0.000000e+00> : vector<8x128xf32>
    %408 = tpu.matmul %407, %250, %cst_107 {dimension_numbers = #tpu.dot_dimension_numbers<[1], [0], [0], [1], [0, 0, 1, 1], [], []>} : vector<8x32xbf16>, vector<32x128xbf16>, vector<8x128xf32> -> vector<8x128xf32>
    %409 = arith.addf %406, %408 : vector<8x128xf32>
    %410 = math.tanh %409 : vector<8x128xf32>
    %411 = arith.negf %409 : vector<8x128xf32>
    %412 = math.exp %411 : vector<8x128xf32>
    %cst_108 = arith.constant 1.000000e+00 : f32
    %413 = vector.broadcast %cst_108 : f32 to vector<8x128xf32>
    %414 = arith.addf %413, %412 : vector<8x128xf32>
    %415 = arith.divf %413, %414 : vector<8x128xf32>
    %416 = vector.shape_cast %5 : vector<1x128xi1> to vector<1x128xi1>
    %417 = vector.broadcast %416 : vector<1x128xi1> to vector<8x128xi1>
    %418 = arith.select %417, %410, %415 : vector<8x128xi1>, vector<8x128xf32>
    %419 = vector.extract_strided_slice %418 {offsets = [0, 0], sizes = [8, 32], strides = [1, 1]} : vector<8x128xf32> to vector<8x32xf32>
    %420 = vector.extract_strided_slice %418 {offsets = [0, 32], sizes = [8, 32], strides = [1, 1]} : vector<8x128xf32> to vector<8x32xf32>
    %421 = vector.extract_strided_slice %418 {offsets = [0, 64], sizes = [8, 32], strides = [1, 1]} : vector<8x128xf32> to vector<8x32xf32>
    %422 = vector.extract_strided_slice %418 {offsets = [0, 96], sizes = [8, 32], strides = [1, 1]} : vector<8x128xf32> to vector<8x32xf32>
    %423 = arith.mulf %420, %401 : vector<8x32xf32>
    %424 = arith.mulf %419, %421 : vector<8x32xf32>
    %425 = arith.addf %423, %424 : vector<8x32xf32>
    %426 = math.tanh %425 : vector<8x32xf32>
    %427 = arith.mulf %422, %426 : vector<8x32xf32>
    %c7_i32_109 = arith.constant 7 : i32
    %428 = arith.index_cast %c7_i32_109 : i32 to index
    %c0_110 = arith.constant 0 : index
    %c0_111 = arith.constant 0 : index
    %429 = vector.load %arg11[%428, %c0_110, %c0_111] : memref<8x8x128xf32, #tpu.memory_space<vmem>>, vector<1x8x128xf32>
    %430 = vector.shape_cast %429 : vector<1x8x128xf32> to vector<8x128xf32>
    %431 = arith.truncf %427 : vector<8x32xf32> to vector<8x32xbf16>
    %cst_112 = arith.constant dense<0.000000e+00> : vector<8x128xf32>
    %432 = tpu.matmul %431, %250, %cst_112 {dimension_numbers = #tpu.dot_dimension_numbers<[1], [0], [0], [1], [0, 0, 1, 1], [], []>} : vector<8x32xbf16>, vector<32x128xbf16>, vector<8x128xf32> -> vector<8x128xf32>
    %433 = arith.addf %430, %432 : vector<8x128xf32>
    %434 = math.tanh %433 : vector<8x128xf32>
    %435 = arith.negf %433 : vector<8x128xf32>
    %436 = math.exp %435 : vector<8x128xf32>
    %cst_113 = arith.constant 1.000000e+00 : f32
    %437 = vector.broadcast %cst_113 : f32 to vector<8x128xf32>
    %438 = arith.addf %437, %436 : vector<8x128xf32>
    %439 = arith.divf %437, %438 : vector<8x128xf32>
    %440 = vector.shape_cast %5 : vector<1x128xi1> to vector<1x128xi1>
    %441 = vector.broadcast %440 : vector<1x128xi1> to vector<8x128xi1>
    %442 = arith.select %441, %434, %439 : vector<8x128xi1>, vector<8x128xf32>
    %443 = vector.extract_strided_slice %442 {offsets = [0, 0], sizes = [8, 32], strides = [1, 1]} : vector<8x128xf32> to vector<8x32xf32>
    %444 = vector.extract_strided_slice %442 {offsets = [0, 32], sizes = [8, 32], strides = [1, 1]} : vector<8x128xf32> to vector<8x32xf32>
    %445 = vector.extract_strided_slice %442 {offsets = [0, 64], sizes = [8, 32], strides = [1, 1]} : vector<8x128xf32> to vector<8x32xf32>
    %446 = vector.extract_strided_slice %442 {offsets = [0, 96], sizes = [8, 32], strides = [1, 1]} : vector<8x128xf32> to vector<8x32xf32>
    %447 = arith.mulf %444, %425 : vector<8x32xf32>
    %448 = arith.mulf %443, %445 : vector<8x32xf32>
    %449 = arith.addf %447, %448 : vector<8x32xf32>
    %450 = math.tanh %449 : vector<8x32xf32>
    %451 = arith.mulf %446, %450 : vector<8x32xf32>
    %c8_i32_114 = arith.constant 8 : i32
    %c0_115 = arith.constant 0 : index
    %c0_116 = arith.constant 0 : index
    %452 = vector.load %arg8[%c0_115, %c0_116] : memref<1x32xf32, #tpu.memory_space<vmem>>, vector<1x32xf32>
    %453 = vector.broadcast %452 : vector<1x32xf32> to vector<8x32xf32>
    %454 = arith.mulf %451, %453 : vector<8x32xf32>
    %cst_117 = arith.constant dense<0.000000e+00> : vector<8xf32>
    %455 = vector.multi_reduction <add>, %454, %cst_117 [1] : vector<8x32xf32> to vector<8xf32>
    %456 = vector.shape_cast %455 : vector<8xf32> to vector<8x1xf32>
    %c0_118 = arith.constant 0 : index
    %c0_119 = arith.constant 0 : index
    %457 = vector.load %arg9[%c0_118, %c0_119] : memref<1x1xf32, #tpu.memory_space<vmem>>, vector<1x1xf32>
    %458 = vector.broadcast %457 : vector<1x1xf32> to vector<8x1xf32>
    %459 = arith.addf %456, %458 : vector<8x1xf32>
    %c0_120 = arith.constant 0 : index
    %c0_121 = arith.constant 0 : index
    %460 = vector.load %arg10[%c0_120, %c0_121] : memref<8x1xf32, #tpu.memory_space<vmem>>, vector<8x1xf32>
    tpu.vector_store %arg10[%c0_120, %c0_121], %459 {strides = array<i32>} : memref<8x1xf32, #tpu.memory_space<vmem>>, vector<8x1xf32>,
    return
  }
  func.func @transform_0(%arg0: i32) -> (i32, i32, i32) {
    %c0_i32 = arith.constant 0 : i32
    %c0_i32_0 = arith.constant 0 : i32
    %c0_i32_1 = arith.constant 0 : i32
    return %c0_i32, %arg0, %c0_i32_0 : i32, i32, i32
  }
  func.func @transform_1(%arg0: i32) -> (i32, i32) {
    %c0_i32 = arith.constant 0 : i32
    %c0_i32_0 = arith.constant 0 : i32
    %c0_i32_1 = arith.constant 0 : i32
    return %c0_i32, %c0_i32_0 : i32, i32
  }
  func.func @transform_2(%arg0: i32) -> (i32, i32) {
    %c0_i32 = arith.constant 0 : i32
    %c0_i32_0 = arith.constant 0 : i32
    %c0_i32_1 = arith.constant 0 : i32
    return %c0_i32, %c0_i32_0 : i32, i32
  }
  func.func @transform_3(%arg0: i32) -> (i32, i32) {
    %c0_i32 = arith.constant 0 : i32
    %c0_i32_0 = arith.constant 0 : i32
    %c0_i32_1 = arith.constant 0 : i32
    return %c0_i32, %c0_i32_0 : i32, i32
  }
  func.func @transform_4(%arg0: i32) -> (i32, i32) {
    %c0_i32 = arith.constant 0 : i32
    %c0_i32_0 = arith.constant 0 : i32
    %c0_i32_1 = arith.constant 0 : i32
    return %c0_i32, %c0_i32_0 : i32, i32
  }
  func.func @transform_5(%arg0: i32) -> (i32, i32) {
    %c0_i32 = arith.constant 0 : i32
    %c0_i32_0 = arith.constant 0 : i32
    %c0_i32_1 = arith.constant 0 : i32
    return %c0_i32, %c0_i32_0 : i32, i32
  }
  func.func @transform_6(%arg0: i32) -> (i32, i32) {
    %c0_i32 = arith.constant 0 : i32
    %c0_i32_0 = arith.constant 0 : i32
    %c0_i32_1 = arith.constant 0 : i32
    return %c0_i32, %c0_i32_0 : i32, i32
  }
  func.func @transform_7(%arg0: i32) -> (i32, i32) {
    %c0_i32 = arith.constant 0 : i32
    %c0_i32_0 = arith.constant 0 : i32
    %c0_i32_1 = arith.constant 0 : i32
    return %c0_i32, %c0_i32_0 : i32, i32
  }
  func.func @transform_8(%arg0: i32) -> (i32, i32) {
    %c0_i32 = arith.constant 0 : i32
    %c0_i32_0 = arith.constant 0 : i32
    %c0_i32_1 = arith.constant 0 : i32
    return %c0_i32, %c0_i32_0 : i32, i32
  }
  func.func @transform_9(%arg0: i32) -> (i32, i32) {
    %c0_i32 = arith.constant 0 : i32
    %c0_i32_0 = arith.constant 0 : i32
    return %arg0, %c0_i32 : i32, i32
  }
}

</mosaic_0001>

<bundles_post_ra>
// kernel: lstm_forward.1
= control target key start
LH: loop header
LB: loop body
LE: loop exit
PB: predicated region body
PF: predicated region fallthrough
CT: control target
= control target key end

     0   :  { %vm93_vm0 = vcmask 1041408   ;;  %vm80_vm1 = vcmask 31744   ;;  %v2036_v1 = vmov 0.0   ;;  %vm2037_vm2 = vmmov 0   ;;  %s2040_s19 = smov 32   ;;  %s2041_s11 = smov 96   ;;  %s2475_s1 = inlined_call_operand.vmem [shape: bf16[4,128], index: 1, kind: input, shape index: {}]   ;;  %s2476_s2 = inlined_call_operand.vmem [shape: bf16[32,128], index: 2, kind: input, shape index: {}]   ;;  %s2477_s0 = inlined_call_operand.vmem [shape: bf16[8,8,4], index: 0, kind: input, shape index: {}]   ;;  %s2478_s3 = inlined_call_operand.vmem [shape: f32[1,128], index: 3, kind: input, shape index: {}]   ;;  %s2479_s4 = inlined_call_operand.vmem [shape: bf16[32,128], index: 4, kind: input, shape index: {}]   ;;  %s2480_s5 = inlined_call_operand.vmem [shape: bf16[32,128], index: 5, kind: input, shape index: {}]   ;;  %s2481_s6 = inlined_call_operand.vmem [shape: f32[1,128], index: 6, kind: input, shape index: {}]   ;;  %s2482_s7 = inlined_call_operand.vmem [shape: f32[1,32], index: 7, kind: input, shape index: {}]   ;;  %s2483_s8 = inlined_call_operand.<no memory space> [shape: f32[1,1], index: 8, kind: input, shape index: {}]   ;;  %s2484_s9 = inlined_call_operand.vmem [shape: f32[8,1], index: 9, kind: output, shape index: {}]  }
   0x1   :  { %v40_v0 = vld [vmem:[%s2475_s1] sm:$0x3]  ;;  %1747 = vmatprep.subr.bf16.mxu1 %v2036_v1  ;;  %1751 = vmatprep.mubr.msk.bf16.mxu1 %vm2037_vm2, %v2036_v1  ;;  %v1896_v5 = vld [vmem:[%s2477_s0 + $0x8] sm:$0xff]   ;;  %v2038_v7 = vmov 0   ;;  %v35_v21 = vlaneseq  ;;  %vm183_vm6 = vcmask 261120   ;;  %v1898_v55 = vld [vmem:[%s2477_s0 + $0x10] sm:$0xff]   ;;  %v14_v24 = vstv %s2483_s8 }
   0x2   :  { %1887 = vmatprep.subr.msk.bf16.mxu0 %vm93_vm0, %v40_v0  ;;  %v95_v2 = vsel %vm93_vm0, %v40_v0, 0  ;;  %v2101_v3 = vld [vmem:[%s2476_s2] sm:$0xff]   ;;  %v2116_v6 = vld [vmem:[%s2476_s2 + $0x8] sm:$0xff]   ;;  %v1899_v56 = vld [vmem:[%s2477_s0 + $0x18] sm:$0xff]   ;;  %vm262_vm7 = vcmask 257024   ;;  %vm1600_vm8 = vcmask 7168  }
   0x3   :  { %1738 = vmatpush3.bf16.msra.mxu0 %v95_v2  ;;  %v1895_v4 = vld [vmem:[%s2477_s0] sm:$0xff]   ;;  %1748 = vmatpush3.bf16.msra.mxu1 %v2101_v3  ;;  %v36_v23 = vand.u32 127, %v35_v21  ;;  %15 = vst [vmem:[#allocation4] sm:$0x1] %v14_v24 }
   0x4   :  { %1763 = vmatprep.subr.bf16.mxu0 %v2036_v1  ;;  %1739 = vmatprep.mubr.msk.bf16.mxu0 %vm80_vm1, %v1895_v4  ;;  %v2135_v8 = vld [vmem:[%s2478_s3] ss:$0 sm:$0xff]  ;;  %s2039_s3 = smov 64  }
   0x5   :  { %1749 = vmatprep.subr.bf16.mxu1 %v2036_v1  ;;  %vm37_vm3 = vcmp.ge.s32.totalorder %v36_v23, 64  ;;  %vm38_vm4 = vcmp.lt.s32.totalorder %v36_v23, 96 }
   0x6   :  { %1740 = vmatmul.mubr.msk.bf16.vlgmr.msra.gmra.mrb[0].mxu0 %vm80_vm1, %v1896_v5  ;;  %vm2142_vm5 = vmand %vm37_vm3, %vm38_vm4 }
   0x7   :  { %1764 = vmatpush3.bf16.msra.mxu0 %v2101_v3  ;;  %1750 = vmatpush3.bf16.msra.mxu1 %v2116_v6 }
   0x8   :  { %1765 = vmatprep.subr.bf16.mxu0 %v2036_v1  ;;  %1755 = vmatprep.subr.bf16.mxu1 %v2036_v1 }
   0x9   :  { %1743 = vmatprep.mubr.msk.bf16.mxu0 %vm80_vm1, %v1898_v55 }
   0xa   :  { %1752 = vmatmul.mubr.bf16.vlgmr.msra.gmra.mrb[0].mxu1 %v2038_v7 }
   0xb   :  { %1766 = vmatpush3.bf16.msra.mxu0 %v2116_v6  ;;  %1756 = vmatpush3.bf16.msra.mxu1 %v2101_v3 }
   0xc   :  { %1759 = vmatprep.mubr.msk.bf16.mxu1 %vm2037_vm2, %v2036_v1  ;;  %1757 = vmatprep.subr.bf16.mxu1 %v2036_v1 }
   0xd   :  { %1779 = vmatprep.subr.bf16.mxu0 %v2036_v1 }
   0xe   :  { %1744 = vmatmul.mubr.msk.bf16.gmra.mrb[4].mxu0 %vm80_vm1, %v1899_v56 }
   0xf   :  { %1758 = vmatpush3.bf16.msra.mxu1 %v2116_v6  ;;  %1767 = vmatprep.mubr.msk.bf16.mxu0 %vm2037_vm2, %v2036_v1 }
  0x10   :  { %1771 = vmatprep.subr.bf16.mxu1 %v2036_v1 }
  0xd9   :  { %v2137_v9 = vpop.f32.mrb[0].mxu0 }
  0xda   :  { %v131_v10 = vpop.f32.mrb[1].mxu0  ;;  %v140_v4 = vadd.f32 %v2137_v9, %v2135_v8 }
  0xdb   :  { %v132_v11 = vadd.f32 %v2135_v8, %v131_v10  ;;  %v2140_v12 = vpop.f32.mrb[2].mxu0 }
  0xdc   :  { %v134_v13 = vpop.f32.mrb[3].mxu0 }
  0xdd   :  { %v221_v14 = vpop.f32.mrb[0].mxu1  ;;  %v135_v38 = vadd.f32 %v2135_v8, %v134_v13 }
  0xde   :  { %v227_v15 = vadd.f32 %v221_v14, %v132_v11  ;;  %v1753_v16 = vpop.f32.mrb[1].mxu1 }
  0xdf   :  { %v224_v17 = vpop.f32.mrb[2].mxu1 }
  0xe0   :  { %v1617_v18 = vmul.f32 -1.442695, %v227_v15  ;;  %v1754_v19 = vpop.f32.mrb[3].mxu1 }
  0xe1   :  { %v2182_v61 = vpop.f32.mrb[4].mxu0 }
  0xe2   :  { %1908 = vpow2.f32 %v1617_v18  ;;  %v2184_v62 = vpop.f32.mrb[5].mxu0 }
  0xe3   :  { %1910 = vtanh.f32 %v227_v15  ;;  %v2186_v63 = vpop.f32.mrb[6].mxu0 }
  0xe4   :  { %v2188_v0 = vpop.f32.mrb[7].mxu0 }
  0xec   :  { %v1909_v20 = vpop.eup %1908 }
  0xed   :  { %v232_v22 = vadd.f32 1.0, %v1909_v20  ;;  %v1911_v25 = vpop.eup %1910 }
  0xef   :  { %1912 = vrcp.f32 %v232_v22 }
  0xf9   :  { %v1913_v26 = vpop.eup %1912 }
  0xfa   :  { %v237_v27 = vsel %vm2142_vm5, %v1911_v25, %v1913_v26 }
  0xfb   :  { %240 = vrot.lane.b32.xlu0 %v237_v27, %s2039_s3  ;;  %v238_v30 = vmul.f32 0.0, %v237_v27 }
 0x16d   :  { %v241_v28 = vpop.permute.xlu0 %240 }
 0x16e   :  { %v243_v29 = vmul.f32 %v241_v28, %v237_v27 }
 0x170   :  { %245 = vrot.lane.b32.xlu0 %v243_v29, %s2040_s19 }
 0x1e2   :  { %v246_v31 = vpop.permute.xlu0 %245 }
 0x1e3   :  { %v248_v32 = vadd.f32 %v246_v31, %v238_v30  ;;  %v143_v31 = vadd.f32 %v2140_v12, %v2135_v8 }
 0x1e5   :  { %1914 = vtanh.f32 %v248_v32 }
 0x1ef   :  { %v1915_v33 = vpop.eup %1914 }
 0x1f0   :  { %251 = vrot.lane.b32.xlu1 %v1915_v33, %s2039_s3 }
 0x262   :  { %v252_v34 = vpop.permute.xlu1 %251 }
 0x263   :  { %v254_v35 = vmul.f32 %v252_v34, %v237_v27 }
 0x265   :  { %v2151_v36 = vpack.c.bf16 %v254_v35, %v254_v35 }
 0x267   :  { %266 = vrot.lane.b32.xlu1 %v2151_v36, %s2040_s19 }
 0x2d9   :  { %v267_v37 = vpop.permute.xlu1 %266 }
 0x2da   :  { %1760 = vmatmul.mubr.msk.bf16.vlgmr.msra.gmra.mrb[4].mxu1 %vm183_vm6, %v267_v37 }
 0x2db   :  { %1772 = vmatpush3.bf16.msra.mxu1 %v2101_v3  ;;  %1775 = vmatprep.mubr.msk.bf16.mxu1 %vm2037_vm2, %v2036_v1 }
 0x2dc   :  { %1773 = vmatprep.subr.bf16.mxu1 %v2036_v1 }
 0x2df   :  { %1774 = vmatpush3.bf16.msra.mxu1 %v2116_v6 }
 0x2e0   :  { %1787 = vmatprep.subr.bf16.mxu1 %v2036_v1 }
 0x3ad   :  { %v305_v39 = vpop.f32.mrb[4].mxu1 }
 0x3ae   :  { %v311_v40 = vadd.f32 %v305_v39, %v135_v38  ;;  %v1761_v41 = vpop.f32.mrb[5].mxu1 }
 0x3af   :  { %v308_v42 = vpop.f32.mrb[6].mxu1 }
 0x3b0   :  { %v1620_v43 = vmul.f32 -1.442695, %v311_v40  ;;  %v1762_v44 = vpop.f32.mrb[7].mxu1 }
 0x3b2   :  { %1916 = vpow2.f32 %v1620_v43 }
 0x3b3   :  { %1918 = vtanh.f32 %v311_v40 }
 0x3bc   :  { %v1917_v45 = vpop.eup %1916 }
 0x3bd   :  { %v316_v46 = vadd.f32 1.0, %v1917_v45  ;;  %v1919_v47 = vpop.eup %1918 }
 0x3bf   :  { %1920 = vrcp.f32 %v316_v46 }
 0x3c9   :  { %v1921_v48 = vpop.eup %1920 }
 0x3ca   :  { %v319_v49 = vsel %vm2142_vm5, %v1919_v47, %v1921_v48 }
 0x3cb   :  { %322 = vrot.lane.b32.xlu0 %v319_v49, %s2039_s3  ;;  %v320_v52 = vmul.f32 %v319_v49, %v248_v32 }
 0x43d   :  { %v323_v50 = vpop.permute.xlu0 %322 }
 0x43e   :  { %v325_v51 = vmul.f32 %v323_v50, %v319_v49 }
 0x440   :  { %327 = vrot.lane.b32.xlu1 %v325_v51, %s2040_s19 }
 0x4b2   :  { %v328_v53 = vpop.permute.xlu1 %327 }
 0x4b3   :  { %v330_v54 = vadd.f32 %v328_v53, %v320_v52  ;;  %v148_v53 = vadd.f32 %v2135_v8, %v2184_v62 }
 0x4b5   :  { %1922 = vtanh.f32 %v330_v54 }
 0x4bf   :  { %v1923_v57 = vpop.eup %1922 }
 0x4c0   :  { %333 = vrot.lane.b32.xlu0 %v1923_v57, %s2039_s3 }
 0x532   :  { %v334_v58 = vpop.permute.xlu0 %333 }
 0x533   :  { %v336_v59 = vmul.f32 %v334_v58, %v319_v49 }
 0x535   :  { %v2178_v60 = vpack.c.bf16 %v336_v59, %v336_v59 }
 0x537   :  { %348 = vrot.lane.b32.xlu1 %v2178_v60, %s2040_s19 }
 0x5a9   :  { %v349_v2 = vpop.permute.xlu1 %348 }
 0x5aa   :  { %1768 = vmatmul.mubr.msk.bf16.vlgmr.msra.gmra.mrb[8].mxu0 %vm183_vm6, %v349_v2 }
 0x5ab   :  { %1780 = vmatpush3.bf16.msra.mxu0 %v2101_v3  ;;  %1783 = vmatprep.mubr.msk.bf16.mxu0 %vm2037_vm2, %v2036_v1 }
 0x5ac   :  { %1781 = vmatprep.subr.bf16.mxu0 %v2036_v1 }
 0x5af   :  { %1782 = vmatpush3.bf16.msra.mxu0 %v2116_v6 }
 0x5b0   :  { %1795 = vmatprep.subr.bf16.mxu0 %v2036_v1 }
 0x67d   :  { %v387_v5 = vpop.f32.mrb[8].mxu0 }
 0x67e   :  { %v393_v10 = vadd.f32 %v387_v5, %v140_v4  ;;  %v1769_v11 = vpop.f32.mrb[9].mxu0 }
 0x67f   :  { %v390_v13 = vpop.f32.mrb[10].mxu0 }
 0x680   :  { %v1623_v14 = vmul.f32 -1.442695, %v393_v10  ;;  %v1770_v15 = vpop.f32.mrb[11].mxu0 }
 0x682   :  { %1924 = vpow2.f32 %v1623_v14 }
 0x683   :  { %1926 = vtanh.f32 %v393_v10 }
 0x68c   :  { %v1925_v16 = vpop.eup %1924 }
 0x68d   :  { %v398_v17 = vadd.f32 1.0, %v1925_v16  ;;  %v1927_v18 = vpop.eup %1926 }
 0x68f   :  { %1928 = vrcp.f32 %v398_v17 }
 0x699   :  { %v1929_v19 = vpop.eup %1928 }
 0x69a   :  { %v401_v20 = vsel %vm2142_vm5, %v1927_v18, %v1929_v19 }
 0x69b   :  { %404 = vrot.lane.b32.xlu0 %v401_v20, %s2039_s3  ;;  %v402_v22 = vmul.f32 %v401_v20, %v330_v54 }
 0x70d   :  { %v405_v21 = vpop.permute.xlu0 %404 }
 0x70e   :  { %v407_v9 = vmul.f32 %v405_v21, %v401_v20 }
 0x710   :  { %409 = vrot.lane.b32.xlu1 %v407_v9, %s2040_s19  ;;  %v151_v9 = vadd.f32 %v2135_v8, %v2188_v0 }
 0x782   :  { %v410_v23 = vpop.permute.xlu1 %409 }
 0x783   :  { %v412_v25 = vadd.f32 %v410_v23, %v402_v22 }
 0x785   :  { %1930 = vtanh.f32 %v412_v25 }
 0x78f   :  { %v1931_v26 = vpop.eup %1930 }
 0x790   :  { %415 = vrot.lane.b32.xlu0 %v1931_v26, %s2039_s3 }
 0x802   :  { %v416_v27 = vpop.permute.xlu0 %415 }
 0x803   :  { %v418_v28 = vmul.f32 %v416_v27, %v401_v20 }
 0x805   :  { %v2204_v29 = vpack.c.bf16 %v418_v28, %v418_v28 }
 0x807   :  { %430 = vrot.lane.b32.xlu1 %v2204_v29, %s2040_s19 }
 0x879   :  { %v431_v30 = vpop.permute.xlu1 %430 }
 0x87a   :  { %1776 = vmatmul.mubr.msk.bf16.vlgmr.msra.gmra.mrb[8].mxu1 %vm183_vm6, %v431_v30 }
 0x87b   :  { %1788 = vmatpush3.bf16.msra.mxu1 %v2101_v3  ;;  %1791 = vmatprep.mubr.msk.bf16.mxu1 %vm2037_vm2, %v2036_v1 }
 0x87c   :  { %1789 = vmatprep.subr.bf16.mxu1 %v2036_v1 }
 0x87f   :  { %1790 = vmatpush3.bf16.msra.mxu1 %v2116_v6 }
 0x880   :  { %1803 = vmatprep.subr.bf16.mxu1 %v2036_v1 }
 0x94d   :  { %v469_v32 = vpop.f32.mrb[8].mxu1 }
 0x94e   :  { %v475_v33 = vadd.f32 %v469_v32, %v143_v31  ;;  %v1777_v34 = vpop.f32.mrb[9].mxu1 }
 0x94f   :  { %v472_v35 = vpop.f32.mrb[10].mxu1 }
 0x950   :  { %v1626_v37 = vmul.f32 -1.442695, %v475_v33  ;;  %v1778_v38 = vpop.f32.mrb[11].mxu1 }
 0x952   :  { %1932 = vpow2.f32 %v1626_v37 }
 0x953   :  { %1934 = vtanh.f32 %v475_v33 }
 0x95c   :  { %v1933_v39 = vpop.eup %1932 }
 0x95d   :  { %v480_v40 = vadd.f32 1.0, %v1933_v39  ;;  %v1935_v41 = vpop.eup %1934 }
 0x95f   :  { %1936 = vrcp.f32 %v480_v40 }
 0x969   :  { %v1937_v42 = vpop.eup %1936 }
 0x96a   :  { %v483_v43 = vsel %vm2142_vm5, %v1935_v41, %v1937_v42 }
 0x96b   :  { %486 = vrot.lane.b32.xlu0 %v483_v43, %s2039_s3  ;;  %v484_v45 = vmul.f32 %v483_v43, %v412_v25 }
 0x9dd   :  { %v487_v44 = vpop.permute.xlu0 %486 }
 0x9de   :  { %v489_v12 = vmul.f32 %v487_v44, %v483_v43 }
 0x9e0   :  { %491 = vrot.lane.b32.xlu1 %v489_v12, %s2040_s19 }
 0xa52   :  { %v492_v46 = vpop.permute.xlu1 %491 }
 0xa53   :  { %v494_v47 = vadd.f32 %v492_v46, %v484_v45 }
 0xa55   :  { %1938 = vtanh.f32 %v494_v47 }
 0xa5f   :  { %v1939_v48 = vpop.eup %1938 }
 0xa60   :  { %497 = vrot.lane.b32.xlu0 %v1939_v48, %s2039_s3 }
 0xad2   :  { %v498_v49 = vpop.permute.xlu0 %497 }
 0xad3   :  { %v500_v50 = vmul.f32 %v498_v49, %v483_v43  ;;  %v156_v43 = vadd.f32 %v2182_v61, %v2135_v8 }
 0xad5   :  { %v2222_v51 = vpack.c.bf16 %v500_v50, %v500_v50 }
 0xad7   :  { %512 = vrot.lane.b32.xlu1 %v2222_v51, %s2040_s19 }
 0xb49   :  { %v513_v52 = vpop.permute.xlu1 %512 }
 0xb4a   :  { %1784 = vmatmul.mubr.msk.bf16.vlgmr.msra.gmra.mrb[12].mxu0 %vm183_vm6, %v513_v52 }
 0xb4b   :  { %1796 = vmatpush3.bf16.msra.mxu0 %v2101_v3  ;;  %1799 = vmatprep.mubr.msk.bf16.mxu0 %vm2037_vm2, %v2036_v1 }
 0xb4c   :  { %1797 = vmatprep.subr.bf16.mxu0 %v2036_v1 }
 0xb4f   :  { %1798 = vmatpush3.bf16.msra.mxu0 %v2116_v6 }
 0xc1d   :  { %v551_v54 = vpop.f32.mrb[12].mxu0 }
 0xc1e   :  { %v557_v55 = vadd.f32 %v551_v54, %v148_v53  ;;  %v1785_v56 = vpop.f32.mrb[13].mxu0 }
 0xc1f   :  { %v554_v57 = vpop.f32.mrb[14].mxu0 }
 0xc20   :  { %v1629_v58 = vmul.f32 -1.442695, %v557_v55  ;;  %v1786_v59 = vpop.f32.mrb[15].mxu0 }
 0xc22   :  { %1940 = vpow2.f32 %v1629_v58 }
 0xc23   :  { %1942 = vtanh.f32 %v557_v55 }
 0xc2c   :  { %v1941_v2 = vpop.eup %1940 }
 0xc2d   :  { %v562_v4 = vadd.f32 1.0, %v1941_v2  ;;  %v1943_v5 = vpop.eup %1942 }
 0xc2f   :  { %1944 = vrcp.f32 %v562_v4  ;;  %v1900_v4 = vld [vmem:[%s2479_s4] sm:$0xff]  }
 0xc30   :  { %1811 = vmatprep.subr.bf16.mxu0 %v1900_v4 }
 0xc39   :  { %v1945_v10 = vpop.eup %1944 }
 0xc3a   :  { %v565_v11 = vsel %vm2142_vm5, %v1943_v5, %v1945_v10 }
 0xc3b   :  { %568 = vrot.lane.b32.xlu0 %v565_v11, %s2039_s3  ;;  %v566_v14 = vmul.f32 %v565_v11, %v494_v47 }
 0xcad   :  { %v569_v13 = vpop.permute.xlu0 %568 }
 0xcae   :  { %v571_v62 = vmul.f32 %v569_v13, %v565_v11 }
 0xcb0   :  { %573 = vrot.lane.b32.xlu1 %v571_v62, %s2040_s19 }
 0xd22   :  { %v574_v15 = vpop.permute.xlu1 %573 }
 0xd23   :  { %v576_v16 = vadd.f32 %v574_v15, %v566_v14  ;;  %v2307_v15 = vld [vmem:[%s2480_s5 + $0x8] sm:$0xff]  }
 0xd25   :  { %1946 = vtanh.f32 %v576_v16 }
 0xd2f   :  { %v1947_v17 = vpop.eup %1946 }
 0xd30   :  { %579 = vrot.lane.b32.xlu0 %v1947_v17, %s2039_s3 }
 0xda2   :  { %v580_v18 = vpop.permute.xlu0 %579 }
 0xda3   :  { %v582_v19 = vmul.f32 %v580_v18, %v565_v11 }
 0xda5   :  { %v2239_v20 = vpack.c.bf16 %v582_v19, %v582_v19 }
 0xda7   :  { %594 = vrot.lane.b32.xlu1 %v2239_v20, %s2040_s19 }
 0xe19   :  { %v595_v21 = vpop.permute.xlu1 %594 }
 0xe1a   :  { %1792 = vmatmul.mubr.msk.bf16.vlgmr.msra.gmra.mrb[12].mxu1 %vm183_vm6, %v595_v21 }
 0xe1b   :  { %1804 = vmatpush3.bf16.msra.mxu1 %v2101_v3  ;;  %1807 = vmatprep.mubr.msk.bf16.mxu1 %vm2037_vm2, %v2036_v1 }
 0xe1c   :  { %1805 = vmatprep.subr.bf16.mxu1 %v2036_v1 }
 0xe1f   :  { %1806 = vmatpush3.bf16.msra.mxu1 %v2116_v6 }
 0xe20   :  { %1823 = vmatprep.subr.bf16.mxu1 %v2036_v1 }
 0xeed   :  { %v633_v22 = vpop.f32.mrb[12].mxu1 }
 0xeee   :  { %v639_v23 = vadd.f32 %v633_v22, %v151_v9  ;;  %v1793_v25 = vpop.f32.mrb[13].mxu1 }
 0xeef   :  { %v636_v26 = vpop.f32.mrb[14].mxu1 }
 0xef0   :  { %v1632_v27 = vmul.f32 -1.442695, %v639_v23  ;;  %v1794_v28 = vpop.f32.mrb[15].mxu1 }
 0xef2   :  { %1948 = vpow2.f32 %v1632_v27  ;;  %v2336_v27 = vld [vmem:[%s2481_s6] ss:$0 sm:$0xff] }
 0xef3   :  { %1950 = vtanh.f32 %v639_v23 }
 0xefc   :  { %v1949_v3 = vpop.eup %1948 }
 0xefd   :  { %v644_v30 = vadd.f32 1.0, %v1949_v3  ;;  %v1951_v31 = vpop.eup %1950 }
 0xeff   :  { %1952 = vrcp.f32 %v644_v30 }
 0xf09   :  { %v1953_v32 = vpop.eup %1952 }
 0xf0a   :  { %v647_v6 = vsel %vm2142_vm5, %v1951_v31, %v1953_v32 }
 0xf0b   :  { %650 = vrot.lane.b32.xlu0 %v647_v6, %s2039_s3  ;;  %v648_v34 = vmul.f32 %v647_v6, %v576_v16 }
 0xf7d   :  { %v651_v33 = vpop.permute.xlu0 %650 }
 0xf7e   :  { %v653_v0 = vmul.f32 %v651_v33, %v647_v6 }
 0xf80   :  { %655 = vrot.lane.b32.xlu1 %v653_v0, %s2040_s19 }
 0xff2   :  { %v656_v35 = vpop.permute.xlu1 %655 }
 0xff3   :  { %v658_v37 = vadd.f32 %v656_v35, %v648_v34 }
 0xff5   :  { %1954 = vtanh.f32 %v658_v37 }
 0xfff   :  { %v1955_v38 = vpop.eup %1954 }
0x1000   :  { %661 = vrot.lane.b32.xlu0 %v1955_v38, %s2039_s3 }
0x1072   :  { %v662_v39 = vpop.permute.xlu0 %661 }
0x1073   :  { %v664_v40 = vmul.f32 %v662_v39, %v647_v6 }
0x1075   :  { %v2257_v41 = vpack.c.bf16 %v664_v40, %v664_v40 }
0x1077   :  { %676 = vrot.lane.b32.xlu1 %v2257_v41, %s2040_s19 }
0x10e9   :  { %v677_v42 = vpop.permute.xlu1 %676 }
0x10ea   :  { %1800 = vmatmul.mubr.msk.bf16.vlgmr.msra.gmra.mrb[16].mxu0 %vm183_vm6, %v677_v42 }
0x10eb   :  { %1812 = vmatpush3.bf16.msra.mxu0 %v1900_v4 }
0x11bd   :  { %v715_v44 = vpop.f32.mrb[16].mxu0 }
0x11be   :  { %v721_v12 = vadd.f32 %v715_v44, %v156_v43  ;;  %v1801_v45 = vpop.f32.mrb[17].mxu0 }
0x11bf   :  { %v718_v46 = vpop.f32.mrb[18].mxu0 }
0x11c0   :  { %v1635_v47 = vmul.f32 -1.442695, %v721_v12  ;;  %v1802_v48 = vpop.f32.mrb[19].mxu0 }
0x11c2   :  { %1956 = vpow2.f32 %v1635_v47 }
0x11c3   :  { %1958 = vtanh.f32 %v721_v12 }
0x11cc   :  { %v1957_v49 = vpop.eup %1956 }
0x11cd   :  { %v726_v50 = vadd.f32 1.0, %v1957_v49  ;;  %v1959_v52 = vpop.eup %1958 }
0x11cf   :  { %1960 = vrcp.f32 %v726_v50 }
0x11d9   :  { %v1961_v53 = vpop.eup %1960 }
0x11da   :  { %v729_v54 = vsel %vm2142_vm5, %v1959_v52, %v1961_v53 }
0x11db   :  { %732 = vrot.lane.b32.xlu0 %v729_v54, %s2039_s3  ;;  %v730_v56 = vmul.f32 %v729_v54, %v658_v37 }
0x124d   :  { %v733_v55 = vpop.permute.xlu0 %732 }
0x124e   :  { %v735_v61 = vmul.f32 %v733_v55, %v729_v54 }
0x1250   :  { %737 = vrot.lane.b32.xlu1 %v735_v61, %s2040_s19 }
0x1254   :  { %259 = vrot.lane.b32.xlu1 %v2151_v36, %s2040_s19  ;;  %v1901_v36 = vld [vmem:[%s2479_s4 + $0x8] sm:$0xff]  }
0x1255   :  { %1813 = vmatprep.subr.bf16.mxu0 %v1901_v36 }
0x1256   :  { %1814 = vmatpush3.bf16.msra.mxu0 %v1901_v36 }
0x1257   :  { %1839 = vmatprep.subr.bf16.mxu0 %v2036_v1 }
0x1258   :  { %423 = vrot.lane.b32.xlu1 %v2204_v29, %s2040_s19 }
0x12c2   :  { %v738_v57 = vpop.permute.xlu1 %737 }
0x12c3   :  { %v2272_v58 = vadd.f32 %v738_v57, %v730_v56 }
0x12c5   :  { %1962 = vtanh.f32 %v2272_v58 }
0x12c6   :  { %v260_v59 = vpop.permute.xlu1 %259 }
0x12c7   :  { %263 = vst.msk [vmem:[#allocation3] sm:$0xf] %vm262_vm7, %v260_v59 }
0x12ca   :  { %v424_v2 = vpop.permute.xlu1 %423 }
0x12cb   :  { %427 = vst.msk [vmem:[#allocation3 + $0x8] sm:$0xf] %vm262_vm7, %v424_v2 }
0x12cf   :  { %v1963_v29 = vpop.eup %1962 }
0x12d0   :  { %743 = vrot.lane.b32.xlu0 %v1963_v29, %s2039_s3 }
0x12d4   :  { %341 = vrot.lane.b32.xlu0 %v2178_v60, %s2040_s19 }
0x12d8   :  { %505 = vrot.lane.b32.xlu0 %v2222_v51, %s2040_s19  ;;  %v2299_v51 = vld [vmem:[%s2480_s5] sm:$0xff]  }
0x1342   :  { %v744_v5 = vpop.permute.xlu0 %743 }
0x1343   :  { %v746_v10 = vmul.f32 %v744_v5, %v729_v54 }
0x1345   :  { %v2289_v11 = vpack.c.bf16 %v746_v10, %v746_v10 }
0x1346   :  { %v342_v13 = vpop.permute.xlu0 %341 }
0x1347   :  { %345 = vst.msk [vmem:[#allocation3 + $0x4] sm:$0xf] %vm262_vm7, %v342_v13  ;;  %758 = vrot.lane.b32.xlu1 %v2289_v11, %s2040_s19 }
0x134a   :  { %v506_v62 = vpop.permute.xlu0 %505 }
0x134b   :  { %509 = vst.msk [vmem:[#allocation3 + $0xc] sm:$0xf] %vm262_vm7, %v506_v62 }
0x134e   :  { %v1902_v14 = vld [vmem:[#allocation3] sm:$0xff]  }
0x134f   :  { %1815 = vmatprep.mubr.msk.bf16.mxu0 %vm183_vm6, %v1902_v14 }
0x1352   :  { %v1903_v60 = vld [vmem:[#allocation3 + $0x8] sm:$0xff]  }
0x1353   :  { %1816 = vmatmul.mubr.msk.bf16.vlgmr.msra.gmra.mrb[20].mxu0 %vm183_vm6, %v1903_v60 }
0x1354   :  { %1840 = vmatpush3.bf16.msra.mxu0 %v2299_v51 }
0x1355   :  { %1841 = vmatprep.subr.bf16.mxu0 %v2036_v1 }
0x1358   :  { %1842 = vmatpush3.bf16.msra.mxu0 %v2307_v15 }
0x1359   :  { %1855 = vmatprep.subr.bf16.mxu0 %v2036_v1 }
0x13b9   :  { %v759_v16 = vpop.permute.xlu1 %758 }
0x13ba   :  { %1808 = vmatmul.mubr.msk.bf16.vlgmr.msra.gmra.mrb[16].mxu1 %vm183_vm6, %v759_v16 }
0x13bb   :  { %1824 = vmatpush3.bf16.msra.mxu1 %v2299_v51  ;;  %1827 = vmatprep.mubr.msk.bf16.mxu1 %vm2037_vm2, %v2036_v1 }
0x13bc   :  { %1825 = vmatprep.subr.bf16.mxu1 %v2036_v1 }
0x13bf   :  { %1826 = vmatpush3.bf16.msra.mxu1 %v2307_v15 }
0x13c0   :  { %1831 = vmatprep.subr.bf16.mxu1 %v2036_v1 }
0x13c2   :  { %1828 = vmatmul.mubr.bf16.vlgmr.msra.gmra.mrb[20].mxu1 %v2038_v7  ;;  %v159_v7 = vadd.f32 %v2186_v63, %v2135_v8 }
0x13c3   :  { %1832 = vmatpush3.bf16.msra.mxu1 %v2299_v51  ;;  %1835 = vmatprep.mubr.msk.bf16.mxu1 %vm2037_vm2, %v2036_v1 }
0x13c4   :  { %1833 = vmatprep.subr.bf16.mxu1 %v2036_v1 }
0x13c7   :  { %1834 = vmatpush3.bf16.msra.mxu1 %v2307_v15 }
0x13c8   :  { %1847 = vmatprep.subr.bf16.mxu1 %v2036_v1 }
0x1426   :  { %v2325_v17 = vpop.f32.mrb[20].mxu0 }
0x1427   :  { %v939_v18 = vpop.f32.mrb[21].mxu0 }
0x1428   :  { %v2327_v19 = vpop.f32.mrb[22].mxu0  ;;  %v940_v28 = vadd.f32 %v2336_v27, %v939_v18 }
0x1429   :  { %v2329_v21 = vpop.f32.mrb[23].mxu0 }
0x142a   :  { %v943_v36 = vadd.f32 %v2336_v27, %v2329_v21 }
0x148d   :  { %v797_v9 = vpop.f32.mrb[16].mxu1 }
0x148e   :  { %v803_v22 = vadd.f32 %v797_v9, %v159_v7  ;;  %v1809_v23 = vpop.f32.mrb[17].mxu1 }
0x148f   :  { %v800_v25 = vpop.f32.mrb[18].mxu1 }
0x1490   :  { %v1810_v26 = vpop.f32.mrb[19].mxu1  ;;  %v1638_v39 = vmul.f32 -1.442695, %v803_v22 }
0x1495   :  { %v1025_v3 = vpop.f32.mrb[20].mxu1 }
0x1496   :  { %v1031_v30 = vadd.f32 %v1025_v3, %v940_v28  ;;  %v1829_v31 = vpop.f32.mrb[21].mxu1 }
0x1497   :  { %v1028_v32 = vpop.f32.mrb[22].mxu1 }
0x1498   :  { %v1653_v6 = vmul.f32 -1.442695, %v1031_v30  ;;  %v1830_v33 = vpop.f32.mrb[23].mxu1 }
0x149a   :  { %1964 = vpow2.f32 %v1653_v6 }
0x149b   :  { %1966 = vtanh.f32 %v1031_v30 }
0x14a4   :  { %v1965_v8 = vpop.eup %1964 }
0x14a5   :  { %v1036_v63 = vadd.f32 1.0, %v1965_v8  ;;  %v1967_v0 = vpop.eup %1966 }
0x14a7   :  { %1968 = vrcp.f32 %v1036_v63 }
0x14a8   :  { %1970 = vpow2.f32 %v1638_v39 }
0x14b1   :  { %v1969_v34 = vpop.eup %1968 }
0x14b2   :  { %v1039_v35 = vsel %vm2142_vm5, %v1967_v0, %v1969_v34  ;;  %v1971_v40 = vpop.eup %1970 }
0x14b3   :  { %1042 = vrot.lane.b32.xlu0 %v1039_v35, %s2039_s3  ;;  %v1040_v42 = vmul.f32 0.0, %v1039_v35  ;;  %v808_v43 = vadd.f32 1.0, %v1971_v40 }
0x1525   :  { %v1043_v37 = vpop.permute.xlu0 %1042 }
0x1526   :  { %v1045_v38 = vmul.f32 %v1043_v37, %v1039_v35  ;;  %v948_v37 = vadd.f32 %v2325_v17, %v2336_v27 }
0x1528   :  { %1047 = vrot.lane.b32.xlu1 %v1045_v38, %s2040_s19 }
0x159a   :  { %v1048_v44 = vpop.permute.xlu1 %1047 }
0x159b   :  { %v1050_v12 = vadd.f32 %v1048_v44, %v1040_v42 }
0x159d   :  { %1972 = vtanh.f32 %v1050_v12 }
0x159e   :  { %1974 = vrcp.f32 %v808_v43 }
0x159f   :  { %1976 = vtanh.f32 %v803_v22 }
0x15a7   :  { %v1973_v45 = vpop.eup %1972 }
0x15a8   :  { %v1975_v46 = vpop.eup %1974  ;;  %1053 = vrot.lane.b32.xlu0 %v1973_v45, %s2039_s3 }
0x15a9   :  { %v1977_v47 = vpop.eup %1976 }
0x15aa   :  { %v811_v48 = vsel %vm2142_vm5, %v1977_v47, %v1975_v46 }
0x15ab   :  { %v812_v61 = vmul.f32 %v811_v48, %v2272_v58 }
0x15ac   :  { %814 = vrot.lane.b32.xlu0 %v811_v48, %s2039_s3 }
0x161a   :  { %v1054_v49 = vpop.permute.xlu0 %1053 }
0x161b   :  { %v1056_v50 = vmul.f32 %v1054_v49, %v1039_v35 }
0x161d   :  { %v1058_v52 = vpack.c.bf16 %v1056_v50, %v1056_v50 }
0x161e   :  { %v815_v53 = vpop.permute.xlu0 %814 }
0x161f   :  { %v817_v54 = vmul.f32 %v815_v53, %v811_v48  ;;  %1060 = vrot.lane.b32.xlu1 %v1058_v52, %s2040_s19 }
0x1621   :  { %819 = vrot.lane.b32.xlu0 %v817_v54, %s2040_s19 }
0x1691   :  { %v1061_v55 = vpop.permute.xlu1 %1060 }
0x1692   :  { %1836 = vmatmul.mubr.msk.bf16.vlgmr.msra.gmra.mrb[24].mxu1 %vm183_vm6, %v1061_v55 }
0x1693   :  { %v820_v56 = vpop.permute.xlu0 %819  ;;  %1848 = vmatpush3.bf16.msra.mxu1 %v2299_v51  ;;  %1851 = vmatprep.mubr.msk.bf16.mxu1 %vm2037_vm2, %v2036_v1 }
0x1694   :  { %v822_v57 = vadd.f32 %v820_v56, %v812_v61  ;;  %1849 = vmatprep.subr.bf16.mxu1 %v2036_v1 }
0x1696   :  { %1978 = vtanh.f32 %v822_v57 }
0x1697   :  { %1850 = vmatpush3.bf16.msra.mxu1 %v2307_v15 }
0x1698   :  { %1863 = vmatprep.subr.bf16.mxu1 %v2036_v1 }
0x16a0   :  { %v1979_v59 = vpop.eup %1978 }
0x16a1   :  { %825 = vrot.lane.b32.xlu0 %v1979_v59, %s2039_s3  ;;  %v951_v59 = vadd.f32 %v2327_v19, %v2336_v27 }
0x16a5   :  { %587 = vrot.lane.b32.xlu0 %v2239_v20, %s2040_s19 }
0x16a9   :  { %751 = vrot.lane.b32.xlu0 %v2289_v11, %s2040_s19 }
0x1713   :  { %v826_v58 = vpop.permute.xlu0 %825 }
0x1714   :  { %v828_v26 = vmul.f32 %v826_v58, %v811_v48 }
0x1716   :  { %v1677_v28 = vpack.c.bf16 %v828_v26, %v828_v26 }
0x1717   :  { %v588_v2 = vpop.permute.xlu0 %587 }
0x1718   :  { %591 = vst.msk [vmem:[#allocation3 + $0x10] sm:$0xf] %vm262_vm7, %v588_v2 }
0x171b   :  { %v752_v4 = vpop.permute.xlu0 %751 }
0x171c   :  { %755 = vst.msk [vmem:[#allocation3 + $0x18] sm:$0xf] %vm262_vm7, %v752_v4 }
0x1765   :  { %v1099_v29 = vpop.f32.mrb[24].mxu1 }
0x1766   :  { %v1105_v5 = vadd.f32 %v1099_v29, %v943_v36  ;;  %v1837_v10 = vpop.f32.mrb[25].mxu1 }
0x1767   :  { %v1102_v13 = vpop.f32.mrb[26].mxu1 }
0x1768   :  { %v1655_v62 = vmul.f32 -1.442695, %v1105_v5  ;;  %v1838_v14 = vpop.f32.mrb[27].mxu1 }
0x176a   :  { %1980 = vpow2.f32 %v1655_v62 }
0x176b   :  { %1982 = vtanh.f32 %v1105_v5 }
0x1774   :  { %v1981_v20 = vpop.eup %1980 }
0x1775   :  { %v1110_v60 = vadd.f32 1.0, %v1981_v20  ;;  %v1983_v11 = vpop.eup %1982 }
0x1777   :  { %1984 = vrcp.f32 %v1110_v60 }
0x1781   :  { %v1985_v16 = vpop.eup %1984 }
0x1782   :  { %v1113_v18 = vsel %vm2142_vm5, %v1983_v11, %v1985_v16 }
0x1783   :  { %1116 = vrot.lane.b32.xlu1 %v1113_v18, %s2039_s3  ;;  %v1114_v9 = vmul.f32 %v1113_v18, %v1050_v12 }
0x17f5   :  { %v1117_v7 = vpop.permute.xlu1 %1116 }
0x17f6   :  { %v1119_v21 = vmul.f32 %v1117_v7, %v1113_v18 }
0x17f8   :  { %1121 = vrot.lane.b32.xlu1 %v1119_v21, %s2040_s19 }
0x186a   :  { %v1122_v22 = vpop.permute.xlu1 %1121 }
0x186b   :  { %v1124_v23 = vadd.f32 %v1122_v22, %v1114_v9 }
0x186d   :  { %1986 = vtanh.f32 %v1124_v23 }
0x1877   :  { %v1987_v25 = vpop.eup %1986 }
0x1878   :  { %1127 = vrot.lane.b32.xlu1 %v1987_v25, %s2039_s3 }
0x187c   :  { %669 = vrot.lane.b32.xlu1 %v2257_v41, %s2040_s19 }
0x1880   :  { %833 = vrot.lane.b32.xlu1 %v1677_v28, %s2040_s19 }
0x18ea   :  { %v1128_v3 = vpop.permute.xlu1 %1127 }
0x18eb   :  { %v1130_v30 = vmul.f32 %v1128_v3, %v1113_v18 }
0x18ed   :  { %v1132_v31 = vpack.c.bf16 %v1130_v30, %v1130_v30 }
0x18ee   :  { %v670_v32 = vpop.permute.xlu1 %669 }
0x18ef   :  { %673 = vst.msk [vmem:[#allocation3 + $0x14] sm:$0xf] %vm262_vm7, %v670_v32  ;;  %1134 = vrot.lane.b32.xlu0 %v1132_v31, %s2040_s19 }
0x18f2   :  { %v834_v6 = vpop.permute.xlu1 %833 }
0x18f3   :  { %837 = vst.msk [vmem:[#allocation3 + $0x1c] sm:$0xf] %vm262_vm7, %v834_v6 }
0x18f6   :  { %v1906_v33 = vld [vmem:[#allocation3 + $0x10] sm:$0xff]  }
0x18f7   :  { %1819 = vmatprep.mubr.msk.bf16.mxu0 %vm183_vm6, %v1906_v33 }
0x18fa   :  { %v1907_v8 = vld [vmem:[#allocation3 + $0x18] sm:$0xff]  }
0x18fb   :  { %1820 = vmatmul.mubr.msk.bf16.gmra.mrb[24].mxu0 %vm183_vm6, %v1907_v8 }
0x18fc   :  { %1843 = vmatprep.mubr.msk.bf16.mxu0 %vm2037_vm2, %v2036_v1 }
0x1961   :  { %v1135_v41 = vpop.permute.xlu0 %1134 }
0x1962   :  { %1844 = vmatmul.mubr.msk.bf16.vlgmr.msra.gmra.mrb[28].mxu0 %vm183_vm6, %v1135_v41 }
0x1963   :  { %1856 = vmatpush3.bf16.msra.mxu0 %v2299_v51  ;;  %1859 = vmatprep.mubr.msk.bf16.mxu0 %vm2037_vm2, %v2036_v1 }
0x1964   :  { %1857 = vmatprep.subr.bf16.mxu0 %v2036_v1 }
0x1967   :  { %1858 = vmatpush3.bf16.msra.mxu0 %v2307_v15 }
0x1968   :  { %1871 = vmatprep.subr.bf16.mxu0 %v2036_v1 }
0x19ce   :  { %v2388_v63 = vpop.f32.mrb[24].mxu0 }
0x19cf   :  { %v2390_v0 = vpop.f32.mrb[25].mxu0 }
0x19d0   :  { %v2392_v34 = vpop.f32.mrb[26].mxu0  ;;  %v956_v25 = vadd.f32 %v2336_v27, %v2390_v0 }
0x19d1   :  { %v2394_v35 = vpop.f32.mrb[27].mxu0 }
0x1a35   :  { %v1173_v38 = vpop.f32.mrb[28].mxu0 }
0x1a36   :  { %v1179_v39 = vadd.f32 %v1173_v38, %v948_v37  ;;  %v1845_v40 = vpop.f32.mrb[29].mxu0 }
0x1a37   :  { %v1176_v42 = vpop.f32.mrb[30].mxu0 }
0x1a38   :  { %v1657_v43 = vmul.f32 -1.442695, %v1179_v39  ;;  %v1846_v44 = vpop.f32.mrb[31].mxu0 }
0x1a3a   :  { %1988 = vpow2.f32 %v1657_v43 }
0x1a3b   :  { %1990 = vtanh.f32 %v1179_v39 }
0x1a44   :  { %v1989_v12 = vpop.eup %1988 }
0x1a45   :  { %v1184_v45 = vadd.f32 1.0, %v1989_v12  ;;  %v1991_v46 = vpop.eup %1990 }
0x1a47   :  { %1992 = vrcp.f32 %v1184_v45 }
0x1a51   :  { %v1993_v47 = vpop.eup %1992 }
0x1a52   :  { %v1187_v48 = vsel %vm2142_vm5, %v1991_v46, %v1993_v47  ;;  %v959_v47 = vadd.f32 %v2336_v27, %v2394_v35 }
0x1a53   :  { %1190 = vrot.lane.b32.xlu1 %v1187_v48, %s2039_s3  ;;  %v1188_v50 = vmul.f32 %v1187_v48, %v1124_v23 }
0x1ac5   :  { %v1191_v49 = vpop.permute.xlu1 %1190 }
0x1ac6   :  { %v1193_v17 = vmul.f32 %v1191_v49, %v1187_v48 }
0x1ac8   :  { %1195 = vrot.lane.b32.xlu0 %v1193_v17, %s2040_s19 }
0x1b3a   :  { %v1196_v52 = vpop.permute.xlu0 %1195 }
0x1b3b   :  { %v1198_v53 = vadd.f32 %v1196_v52, %v1188_v50 }
0x1b3d   :  { %1994 = vtanh.f32 %v1198_v53 }
0x1b47   :  { %v1995_v54 = vpop.eup %1994 }
0x1b48   :  { %1201 = vrot.lane.b32.xlu1 %v1995_v54, %s2039_s3 }
0x1bba   :  { %v1202_v55 = vpop.permute.xlu1 %1201 }
0x1bbb   :  { %v1204_v61 = vmul.f32 %v1202_v55, %v1187_v48 }
0x1bbd   :  { %v1206_v56 = vpack.c.bf16 %v1204_v61, %v1204_v61 }
0x1bbf   :  { %1208 = vrot.lane.b32.xlu0 %v1206_v56, %s2040_s19 }
0x1c31   :  { %v1209_v57 = vpop.permute.xlu0 %1208 }
0x1c32   :  { %1852 = vmatmul.mubr.msk.bf16.vlgmr.msra.gmra.mrb[28].mxu1 %vm183_vm6, %v1209_v57 }
0x1c33   :  { %1864 = vmatpush3.bf16.msra.mxu1 %v2299_v51  ;;  %1867 = vmatprep.mubr.msk.bf16.mxu1 %vm2037_vm2, %v2036_v1 }
0x1c34   :  { %1865 = vmatprep.subr.bf16.mxu1 %v2036_v1 }
0x1c37   :  { %1866 = vmatpush3.bf16.msra.mxu1 %v2307_v15 }
0x1c38   :  { %1879 = vmatprep.subr.bf16.mxu1 %v2036_v1 }
0x1d05   :  { %v1247_v58 = vpop.f32.mrb[28].mxu1 }
0x1d06   :  { %v1253_v2 = vadd.f32 %v1247_v58, %v951_v59  ;;  %v1853_v4 = vpop.f32.mrb[29].mxu1 }
0x1d07   :  { %v1250_v36 = vpop.f32.mrb[30].mxu1 }
0x1d08   :  { %v1659_v29 = vmul.f32 -1.442695, %v1253_v2  ;;  %v1854_v5 = vpop.f32.mrb[31].mxu1 }
0x1d09   :  { %v964_v5 = vadd.f32 %v2388_v63, %v2336_v27 }
0x1d0a   :  { %1996 = vpow2.f32 %v1659_v29 }
0x1d0b   :  { %1998 = vtanh.f32 %v1253_v2 }
0x1d14   :  { %v1997_v10 = vpop.eup %1996 }
0x1d15   :  { %v1258_v13 = vadd.f32 1.0, %v1997_v10  ;;  %v1999_v62 = vpop.eup %1998 }
0x1d17   :  { %2000 = vrcp.f32 %v1258_v13 }
0x1d21   :  { %v2001_v14 = vpop.eup %2000 }
0x1d22   :  { %v1261_v20 = vsel %vm2142_vm5, %v1999_v62, %v2001_v14 }
0x1d23   :  { %1264 = vrot.lane.b32.xlu1 %v1261_v20, %s2039_s3  ;;  %v1262_v11 = vmul.f32 %v1261_v20, %v1198_v53 }
0x1d95   :  { %v1265_v60 = vpop.permute.xlu1 %1264 }
0x1d96   :  { %v1267_v19 = vmul.f32 %v1265_v60, %v1261_v20 }
0x1d98   :  { %1269 = vrot.lane.b32.xlu0 %v1267_v19, %s2040_s19 }
0x1e0a   :  { %v1270_v16 = vpop.permute.xlu0 %1269 }
0x1e0b   :  { %v1272_v18 = vadd.f32 %v1270_v16, %v1262_v11 }
0x1e0d   :  { %2002 = vtanh.f32 %v1272_v18 }
0x1e17   :  { %v2003_v7 = vpop.eup %2002 }
0x1e18   :  { %1275 = vrot.lane.b32.xlu1 %v2003_v7, %s2039_s3 }
0x1e8a   :  { %v1276_v21 = vpop.permute.xlu1 %1275 }
0x1e8b   :  { %v1278_v9 = vmul.f32 %v1276_v21, %v1261_v20 }
0x1e8d   :  { %v1280_v22 = vpack.c.bf16 %v1278_v9, %v1278_v9 }
0x1e8f   :  { %1282 = vrot.lane.b32.xlu0 %v1280_v22, %s2040_s19 }
0x1f01   :  { %v1283_v23 = vpop.permute.xlu0 %1282 }
0x1f02   :  { %1860 = vmatmul.mubr.msk.bf16.vlgmr.msra.gmra.mrb[32].mxu0 %vm183_vm6, %v1283_v23 }
0x1f03   :  { %1872 = vmatpush3.bf16.msra.mxu0 %v2299_v51  ;;  %1875 = vmatprep.mubr.msk.bf16.mxu0 %vm2037_vm2, %v2036_v1 }
0x1f04   :  { %1873 = vmatprep.subr.bf16.mxu0 %v2036_v1 }
0x1f07   :  { %1874 = vmatpush3.bf16.msra.mxu0 %v2307_v15 }
0x1fd5   :  { %v1321_v26 = vpop.f32.mrb[32].mxu0 }
0x1fd6   :  { %v1327_v28 = vadd.f32 %v1321_v26, %v956_v25  ;;  %v1861_v3 = vpop.f32.mrb[33].mxu0 }
0x1fd7   :  { %v1324_v30 = vpop.f32.mrb[34].mxu0 }
0x1fd8   :  { %v1661_v31 = vmul.f32 -1.442695, %v1327_v28  ;;  %v1862_v32 = vpop.f32.mrb[35].mxu0 }
0x1fda   :  { %2004 = vpow2.f32 %v1661_v31  ;;  %v967_v31 = vadd.f32 %v2392_v34, %v2336_v27  ;;  %v1668_v34 = vld [vmem:[%s2482_s7] ss:$0 sm:$0xff] }
0x1fdb   :  { %2006 = vtanh.f32 %v1327_v28 }
0x1fe4   :  { %v2005_v6 = vpop.eup %2004 }
0x1fe5   :  { %v1332_v33 = vadd.f32 1.0, %v2005_v6  ;;  %v2007_v8 = vpop.eup %2006 }
0x1fe7   :  { %2008 = vrcp.f32 %v1332_v33 }
0x1ff1   :  { %v2009_v41 = vpop.eup %2008 }
0x1ff2   :  { %v1335_v37 = vsel %vm2142_vm5, %v2007_v8, %v2009_v41 }
0x1ff3   :  { %1338 = vrot.lane.b32.xlu1 %v1335_v37, %s2039_s3  ;;  %v1336_v39 = vmul.f32 %v1335_v37, %v1272_v18 }
0x2065   :  { %v1339_v38 = vpop.permute.xlu1 %1338 }
0x2066   :  { %v1341_v0 = vmul.f32 %v1339_v38, %v1335_v37 }
0x2068   :  { %1343 = vrot.lane.b32.xlu0 %v1341_v0, %s2040_s19 }
0x20da   :  { %v1344_v40 = vpop.permute.xlu0 %1343 }
0x20db   :  { %v1346_v42 = vadd.f32 %v1344_v40, %v1336_v39 }
0x20dd   :  { %2010 = vtanh.f32 %v1346_v42 }
0x20e7   :  { %v2011_v43 = vpop.eup %2010 }
0x20e8   :  { %1349 = vrot.lane.b32.xlu1 %v2011_v43, %s2039_s3 }
0x215a   :  { %v1350_v44 = vpop.permute.xlu1 %1349 }
0x215b   :  { %v1352_v12 = vmul.f32 %v1350_v44, %v1335_v37 }
0x215d   :  { %v1354_v45 = vpack.c.bf16 %v1352_v12, %v1352_v12 }
0x215f   :  { %1356 = vrot.lane.b32.xlu0 %v1354_v45, %s2040_s19 }
0x21d1   :  { %v1357_v46 = vpop.permute.xlu0 %1356 }
0x21d2   :  { %1868 = vmatmul.mubr.msk.bf16.vlgmr.msra.gmra.mrb[32].mxu1 %vm183_vm6, %v1357_v46 }
0x21d3   :  { %1880 = vmatpush3.bf16.msra.mxu1 %v2299_v51  ;;  %1883 = vmatprep.mubr.msk.bf16.mxu1 %vm2037_vm2, %v2036_v1 }
0x21d4   :  { %1881 = vmatprep.subr.bf16.mxu1 %v2036_v1 }
0x21d7   :  { %1882 = vmatpush3.bf16.msra.mxu1 %v2307_v15 }
0x22a5   :  { %v1395_v48 = vpop.f32.mrb[32].mxu1 }
0x22a6   :  { %v1401_v49 = vadd.f32 %v1395_v48, %v959_v47  ;;  %v1869_v17 = vpop.f32.mrb[33].mxu1 }
0x22a7   :  { %v1398_v50 = vpop.f32.mrb[34].mxu1 }
0x22a8   :  { %v1663_v52 = vmul.f32 -1.442695, %v1401_v49  ;;  %v1870_v53 = vpop.f32.mrb[35].mxu1 }
0x22a9   :  { %v1669_v53 = vld [vmem:[#allocation4] ss:$0 sm:$0xff] }
0x22aa   :  { %2012 = vpow2.f32 %v1663_v52 }
0x22ab   :  { %2014 = vtanh.f32 %v1401_v49 }
0x22b4   :  { %v2013_v54 = vpop.eup %2012 }
0x22b5   :  { %v1406_v55 = vadd.f32 1.0, %v2013_v54  ;;  %v2015_v51 = vpop.eup %2014 }
0x22b7   :  { %2016 = vrcp.f32 %v1406_v55 }
0x22c1   :  { %v2017_v61 = vpop.eup %2016 }
0x22c2   :  { %v1409_v1 = vsel %vm2142_vm5, %v2015_v51, %v2017_v61 }
0x22c3   :  { %1412 = vrot.lane.b32.xlu1 %v1409_v1, %s2039_s3  ;;  %v1410_v56 = vmul.f32 %v1409_v1, %v1346_v42 }
0x2335   :  { %v1413_v15 = vpop.permute.xlu1 %1412 }
0x2336   :  { %v1415_v35 = vmul.f32 %v1413_v15, %v1409_v1 }
0x2338   :  { %1417 = vrot.lane.b32.xlu0 %v1415_v35, %s2040_s19 }
0x23aa   :  { %v1418_v57 = vpop.permute.xlu0 %1417 }
0x23ab   :  { %v1420_v59 = vadd.f32 %v1418_v57, %v1410_v56 }
0x23ad   :  { %2018 = vtanh.f32 %v1420_v59 }
0x23b7   :  { %v2019_v58 = vpop.eup %2018 }
0x23b8   :  { %1423 = vrot.lane.b32.xlu1 %v2019_v58, %s2039_s3 }
0x242a   :  { %v1424_v2 = vpop.permute.xlu1 %1423 }
0x242b   :  { %v1426_v4 = vmul.f32 %v1424_v2, %v1409_v1 }
0x242d   :  { %v1428_v36 = vpack.c.bf16 %v1426_v4, %v1426_v4 }
0x242f   :  { %1430 = vrot.lane.b32.xlu0 %v1428_v36, %s2040_s19 }
0x24a1   :  { %v1431_v29 = vpop.permute.xlu0 %1430 }
0x24a2   :  { %1876 = vmatmul.mubr.msk.bf16.vlgmr.msra.gmra.mrb[36].mxu0 %vm183_vm6, %v1431_v29 }
0x2575   :  { %v1469_v10 = vpop.f32.mrb[36].mxu0 }
0x2576   :  { %v1475_v13 = vadd.f32 %v1469_v10, %v964_v5  ;;  %v1877_v62 = vpop.f32.mrb[37].mxu0 }
0x2577   :  { %v1472_v14 = vpop.f32.mrb[38].mxu0 }
0x2578   :  { %v1665_v20 = vmul.f32 -1.442695, %v1475_v13  ;;  %v1878_v60 = vpop.f32.mrb[39].mxu0 }
0x257a   :  { %2020 = vpow2.f32 %v1665_v20 }
0x257b   :  { %2022 = vtanh.f32 %v1475_v13 }
0x2584   :  { %v2021_v19 = vpop.eup %2020 }
0x2585   :  { %v1480_v11 = vadd.f32 1.0, %v2021_v19  ;;  %v2023_v16 = vpop.eup %2022 }
0x2587   :  { %2024 = vrcp.f32 %v1480_v11 }
0x2591   :  { %v2025_v18 = vpop.eup %2024 }
0x2592   :  { %v1483_v7 = vsel %vm2142_vm5, %v2023_v16, %v2025_v18 }
0x2593   :  { %1486 = vrot.lane.b32.xlu1 %v1483_v7, %s2039_s3  ;;  %v1484_v9 = vmul.f32 %v1483_v7, %v1420_v59 }
0x2605   :  { %v1487_v21 = vpop.permute.xlu1 %1486 }
0x2606   :  { %v1489_v63 = vmul.f32 %v1487_v21, %v1483_v7 }
0x2608   :  { %1491 = vrot.lane.b32.xlu0 %v1489_v63, %s2040_s19 }
0x267a   :  { %v1492_v22 = vpop.permute.xlu0 %1491 }
0x267b   :  { %v1494_v23 = vadd.f32 %v1492_v22, %v1484_v9 }
0x267d   :  { %2026 = vtanh.f32 %v1494_v23 }
0x2687   :  { %v2027_v25 = vpop.eup %2026 }
0x2688   :  { %1497 = vrot.lane.b32.xlu1 %v2027_v25, %s2039_s3 }
0x26fa   :  { %v1498_v26 = vpop.permute.xlu1 %1497 }
0x26fb   :  { %v1500_v28 = vmul.f32 %v1498_v26, %v1483_v7 }
0x26fd   :  { %v1502_v3 = vpack.c.bf16 %v1500_v28, %v1500_v28 }
0x26ff   :  { %1504 = vrot.lane.b32.xlu0 %v1502_v3, %s2040_s19 }
0x2771   :  { %v1505_v30 = vpop.permute.xlu0 %1504 }
0x2772   :  { %1884 = vmatmul.mubr.msk.bf16.vlgmr.msra.gmra.mrb[36].mxu1 %vm183_vm6, %v1505_v30 }
0x2845   :  { %v1543_v32 = vpop.f32.mrb[36].mxu1 }
0x2846   :  { %v1549_v6 = vadd.f32 %v1543_v32, %v967_v31  ;;  %v1885_v33 = vpop.f32.mrb[37].mxu1 }
0x2847   :  { %v1546_v8 = vpop.f32.mrb[38].mxu1 }
0x2848   :  { %v1667_v41 = vmul.f32 -1.442695, %v1549_v6  ;;  %v1886_v37 = vpop.f32.mrb[39].mxu1 }
0x284a   :  { %2028 = vpow2.f32 %v1667_v41 }
0x284b   :  { %2030 = vtanh.f32 %v1549_v6 }
0x2854   :  { %v2029_v38 = vpop.eup %2028 }
0x2855   :  { %v1554_v0 = vadd.f32 1.0, %v2029_v38  ;;  %v2031_v39 = vpop.eup %2030 }
0x2857   :  { %2032 = vrcp.f32 %v1554_v0 }
0x2861   :  { %v2033_v40 = vpop.eup %2032 }
0x2862   :  { %v1557_v42 = vsel %vm2142_vm5, %v2031_v39, %v2033_v40 }
0x2863   :  { %1560 = vrot.lane.b32.xlu1 %v1557_v42, %s2039_s3  ;;  %v1558_v44 = vmul.f32 %v1557_v42, %v1494_v23 }
0x28d5   :  { %v1561_v43 = vpop.permute.xlu1 %1560 }
0x28d6   :  { %v1563_v27 = vmul.f32 %v1561_v43, %v1557_v42 }
0x28d8   :  { %1565 = vrot.lane.b32.xlu0 %v1563_v27, %s2040_s19 }
0x28dc   :  { %1581 = vrot.lane.b32.xlu0 %v1668_v34, %s2041_s11 }
0x294a   :  { %v1566_v12 = vpop.permute.xlu0 %1565 }
0x294b   :  { %v1568_v45 = vadd.f32 %v1566_v12, %v1558_v44 }
0x294d   :  { %2034 = vtanh.f32 %v1568_v45 }
0x294e   :  { %v1582_v48 = vpop.permute.xlu0 %1581 }
0x2957   :  { %v2035_v46 = vpop.eup %2034 }
0x2958   :  { %1571 = vrot.lane.b32.xlu1 %v2035_v46, %s2039_s3 }
0x29ca   :  { %v1572_v47 = vpop.permute.xlu1 %1571 }
0x29cb   :  { %v1574_v49 = vmul.f32 %v1572_v47, %v1557_v42 }
0x29cd   :  { %v1584_v17 = vmul.f32 %v1582_v48, %v1574_v49 }
0x29cf   :  { %1586 = vrot.lane.b32.xlu1 %v1584_v17, %s2040_s19 }
0x2a41   :  { %v1587_v50 = vpop.permute.xlu1 %1586 }
0x2a42   :  { %v1589_v52 = vsel %vm183_vm6, %v1587_v50, 0.0 }
0x2a43   :  { %1590 = vadd.xlane.f32.xlu0 %v1589_v52 }
0x2ad0   :  { %v1591_v54 = vpop.xlane.xlu0 %1590 }
0x2ad1   :  { %v1599_v55 = vadd.f32 %v1669_v53, %v1591_v54 }
0x2ad3   :  { %1601 = vst.msk [vmem:[%s2484_s9] sm:$0xff] %vm1600_vm8, %v1599_v55 }

</bundles_post_ra>
